<compile_context>
chip_gen: v7x
topology: tpu7x:2x2x1
jax: 0.10.0
libtpu: 0.0.40
codegen_flags: <defaults>
</compile_context>

<pallas_src>
import functools
import math
from statistics import NormalDist

import numpy as np
import jax
import jax.numpy as jnp
from jax.experimental import pallas as pl
from jax.experimental.pallas import tpu as pltpu


def _round_up(x, m):
    return ((x + m - 1) // m) * m


# ----------------------------------------------------------------------------
# Deterministic parameter init (replicates strict_standard_normal without torch)
# ----------------------------------------------------------------------------
def strict_standard_normal(d, seed=0):
    np.random.seed(seed)
    y = np.linspace(0.0, 1.0, d + 2)[1:-1]          # interior quantiles only
    nd = NormalDist()
    x = np.array([nd.inv_cdf(float(p)) for p in y], dtype=np.float64)
    np.random.shuffle(x)                             # writable copy -> OK
    return x.astype(np.float32)


def make_A(pt_dim, enc_dim, alpha=6.0, seed=0):
    rows = [strict_standard_normal(enc_dim, seed + i) for i in range(pt_dim)]
    return jnp.asarray(np.stack(rows, axis=0) * alpha, dtype=jnp.float32)  # (pt_dim, enc_dim)


# ----------------------------------------------------------------------------
# Pallas kernel
# ----------------------------------------------------------------------------
def _veckm_kernel(pts_i_ref, ptsT_j_ref, ai_ref, bj_ref, epA_j_ref, epA_i_ref,
                  out_ref, *, radius, sqrt_d, D, pt_dim, exact_distances):
    k = pl.program_id(1)

    @pl.when(k == 0)
    def _():
        out_ref[...] = jnp.zeros_like(out_ref)

    pts_i = pts_i_ref[...]      # (TM, pt_dim) f32 query points
    ptsT_j = ptsT_j_ref[...]    # (pt_dim, TK) f32 neighbor points, transposed
    epA_j = epA_j_ref[...]      # (TK, 2D), f32 or bf16

    if exact_distances:
        # Difference form: bit-exact neighbor classification (matches the
        # reference cdist numerics).  ~10 VPU ops / element.
        diff = pts_i[:, 0:1] - ptsT_j[0:1, :]
        d2 = diff * diff
        for c in range(1, pt_dim):
            diff = pts_i[:, c:c + 1] - ptsT_j[c:c + 1, :]
            d2 = d2 + diff * diff
        J = (d2 < radius * radius).astype(epA_j.dtype)   # 0/1, exact in bf16
    else:
        # Expanded form with per-point half-norms hoisted to the wrapper:
        #   ||xi - xj||^2 < r^2   <=>   xi.xj > 0.5*(|xi|^2 + |xj|^2 - r^2)
        # Only the pt_dim-wide dot + one bias add + compare + cast run on the
        # VPU (~8 ops / element), trimming the VALU overhang on v6e/v7x without
        # spending a second MXU pass on a K=3 matmul.
        cross = pts_i[:, 0:1] * ptsT_j[0:1, :]
        for c in range(1, pt_dim):
            cross = cross + pts_i[:, c:c + 1] * ptsT_j[c:c + 1, :]
        thresh = ai_ref[...] + bj_ref[...]               # (TM,1)+(1,TK) -> (TM,TK)
        J = (cross > thresh).astype(epA_j.dtype)         # 0/1, exact in bf16

    # Accumulate G_tile += J @ epA_j on the MXU directly into the resident
    # output block (no extra scratch, no final copy).
    out_ref[...] += jnp.dot(J, epA_j, preferred_element_type=jnp.float32)

    @pl.when(k == pl.num_programs(1) - 1)
    def _():
        epA_i = epA_i_ref[...]                           # (TM, 2D) f32
        c = epA_i[:, :D]
        s = epA_i[:, D:]
        G = out_ref[...]
        Gc = G[:, :D]
        Gs = G[:, D:]
        # Complex division by unit-modulus epA_i == multiply by its conjugate.
        re = Gc * c + Gs * s
        im = Gs * c - Gc * s
        # L2-normalize over the complex encoding dim, scale by sqrt(enc_dim).
        scale = sqrt_d * jax.lax.rsqrt(
            jnp.sum(re * re + im * im, axis=-1, keepdims=True))
        out_ref[...] = jnp.concatenate([re, im], axis=-1) * scale


# ----------------------------------------------------------------------------
# Wrapper
# ----------------------------------------------------------------------------
def exact_veckm(pts, A, radius, *, tm=1024, tk=2048,
                accum_dtype=jnp.bfloat16, exact_distances=False):
    """Pallas implementation of ExactVecKM.forward.

    Args:
      pts: (N, pt_dim) float32 point cloud.
      A:   (pt_dim, enc_dim) float32 fixed random projection.
      radius: float ball-query radius.
      accum_dtype: dtype of the streamed epA tile / J for the MXU accumulation
        (bf16 = fast path, f32 = max precision).
      exact_distances: use the bit-exact difference-form distances (use on v5e
        or when radius-boundary ties must match the reference exactly).
    Returns:
      (N, enc_dim) complex64 local geometry encoding.
    """
    N, pt_dim = pts.shape
    D = A.shape[1]
    assert D % 128 == 0, "enc_dim must be a multiple of 128"
    sqrt_d = float(D) ** 0.5
    r = float(radius)
    acc_bytes = jnp.dtype(accum_dtype).itemsize

    # ---- tile plan ----------------------------------------------------------
    tm = max(8, min(tm, _round_up(N, 8)))
    tk = max(128, min(tk, _round_up(N, 128)))

    def _vmem_bytes(tm_, tk_):
        # Double-buffered BlockSpec streams (small operands pad to (8,128) tiles)
        blk = 2 * (tm_ * 128 * 4            # pts_i   (pt_dim lanes pad to 128)
                   + 8 * tk_ * 4            # ptsT_j  (pt_dim sublanes pad to 8)
                   + tm_ * 128 * 4          # ai      (1 lane pads to 128)
                   + 8 * tk_ * 4            # bj      (1 sublane pads to 8)
                   + tk_ * 2 * D * acc_bytes    # epA_j
                   + tm_ * 2 * D * 4        # epA_i
                   + tm_ * 2 * D * 4)       # resident output accumulator
        return blk + 2 * tm_ * tk_ * 4      # headroom for (TM,TK) temporaries / J

    # Shrink the plan if it would not fit v7x's 64 MiB physical VMEM.
    while _vmem_bytes(tm, tk) > 40 * 2 ** 20 and tk > 512:
        tk //= 2
    while _vmem_bytes(tm, tk) > 40 * 2 ** 20 and tm > 512:
        tm //= 2

    # Megacore guard (v7x): keep >= 2 row blocks so both TensorCores get work.
    if _round_up(N, tm) // tm < 2 and tm % 16 == 0:
        tm //= 2

    n_pad = _round_up(N, math.lcm(tm, tk))

    pts = pts.astype(jnp.float32)
    if n_pad != N:
        # Dummy points far outside every real neighborhood: they never pass the
        # radius test against real points, and their (garbage) rows are sliced
        # off below.  Keeps the big tiles usable for awkward N.
        pad = jnp.full((n_pad - N, pt_dim), 1.0e3 * (1.0 + r), dtype=jnp.float32)
        pts = jnp.concatenate([pts, pad], axis=0)

    ptsT = pts.T                                             # (pt_dim, n_pad)
    nsq = jnp.sum(pts * pts, axis=1, keepdims=True)          # (n_pad, 1)
    ai = 0.5 * nsq - 0.5 * (r * r)                           # (n_pad, 1)
    bj = 0.5 * nsq.T                                         # (1, n_pad)

    # Hoisted neighbor-feature precompute (one-time, plain XLA).
    pA = (pts / r) @ A.astype(jnp.float32)                   # (n_pad, D)
    epA = jnp.concatenate([jnp.cos(pA), jnp.sin(pA)], axis=1)  # (n_pad, 2D) f32
    epA_k = epA.astype(accum_dtype)                          # streamed per k-step

    kernel = functools.partial(_veckm_kernel, radius=r, sqrt_d=sqrt_d, D=D,
                               pt_dim=pt_dim, exact_distances=exact_distances)

    vmem_limit = int(min(56 * 2 ** 20,
                         max(32 * 2 ** 20, _vmem_bytes(tm, tk) * 3 // 2)))

    out = pl.pallas_call(
        kernel,
        out_shape=jax.ShapeDtypeStruct((n_pad, 2 * D), jnp.float32),
        grid_spec=pltpu.PrefetchScalarGridSpec(
            num_scalar_prefetch=0,
            grid=(n_pad // tm, n_pad // tk),
            in_specs=[
                pl.BlockSpec((tm, pt_dim), lambda i, k: (i, 0)),   # query points
                pl.BlockSpec((pt_dim, tk), lambda i, k: (0, k)),   # neighbor pts^T
                pl.BlockSpec((tm, 1), lambda i, k: (i, 0)),        # 0.5|xi|^2 - 0.5r^2
                pl.BlockSpec((1, tk), lambda i, k: (0, k)),        # 0.5|xj|^2
                pl.BlockSpec((tk, 2 * D), lambda i, k: (k, 0)),    # epA (neighbors)
                pl.BlockSpec((tm, 2 * D), lambda i, k: (i, 0)),    # epA (queries, f32)
            ],
            out_specs=pl.BlockSpec((tm, 2 * D), lambda i, k: (i, 0)),
        ),
        compiler_params=pltpu.CompilerParams(
            dimension_semantics=("parallel", "arbitrary"),
            vmem_limit_bytes=vmem_limit),
    )(pts, ptsT, ai, bj, epA_k, epA)

    out = out[:N]
    return jax.lax.complex(out[:, :D], out[:, D:])


# ----------------------------------------------------------------------------
# Plain-JAX reference (mirrors the PyTorch forward)
# ----------------------------------------------------------------------------
def exact_veckm_ref(pts, A, radius):
    D = A.shape[1]
    diff = pts[:, None, :] - pts[None, :, :]
    d2 = jnp.sum(diff * diff, axis=-1)
    J = (d2 < radius * radius).astype(jnp.float32)
    pA = (pts / radius) @ A
    epA = jnp.concatenate([jnp.cos(pA), jnp.sin(pA)], axis=1)
    G = J @ epA
    Gc = jax.lax.complex(G[:, :D], G[:, D:])
    ep = jax.lax.complex(epA[:, :D], epA[:, D:])
    G = Gc / ep
    G = G / jnp.linalg.norm(G, axis=-1, keepdims=True) * (float(D) ** 0.5)
    return G


if __name__ == "__main__":
    # Small, TPU-tile-friendly shapes consistent with the module:
    # N points of dimension pt_dim=3, encoding dim enc_dim=128.
    N, pt_dim, enc_dim = 512, 3, 128
    radius = 0.3

    key = jax.random.PRNGKey(0)
    # Snap the points to a 1/32 grid: every pairwise d^2 is then an exact
    # multiple of 1/1024 while r^2 = 0.09 is ~1.8e-4 away from the nearest one,
    # so neighbor classification is unambiguous in every distance formulation
    # (no flaky radius-boundary ties between the kernel and the reference).
    pts = jnp.floor(jax.random.uniform(key, (N, pt_dim), dtype=jnp.float32) * 32.0) / 32.0
    A = make_A(pt_dim, enc_dim, alpha=6.0, seed=0)

    G_ref = jax.block_until_ready(exact_veckm_ref(pts, A, radius))

    # 1) Accuracy path: f32 accumulation, bit-exact difference-form distances,
    #    small tiles to exercise the multi-step k-reduction (grid 4x4).
    G32 = jax.block_until_ready(
        exact_veckm(pts, A, radius, tm=128, tk=128,
                    accum_dtype=jnp.float32, exact_distances=True))
    assert G32.shape == (N, enc_dim) and G32.dtype == jnp.complex64
    np.testing.assert_allclose(np.asarray(G32.real), np.asarray(G_ref.real),
                               rtol=5e-3, atol=5e-3)
    np.testing.assert_allclose(np.asarray(G32.imag), np.asarray(G_ref.imag),
                               rtol=5e-3, atol=5e-3)

    # 2) Default fast path: large tiles (clamped to N, >=2 row blocks for
    #    megacore), bf16 epA/J on the MXU, hoisted-norm distance test.
    G16 = jax.block_until_ready(exact_veckm(pts, A, radius))
    assert G16.shape == (N, enc_dim) and G16.dtype == jnp.complex64
    np.testing.assert_allclose(np.asarray(G16.real), np.asarray(G_ref.real),
                               rtol=5e-2, atol=5e-2)
    np.testing.assert_allclose(np.asarray(G16.imag), np.asarray(G_ref.imag),
                               rtol=5e-2, atol=5e-2)

    print("KERNEL_OK")
</pallas_src>

<mosaic_0001>
module attributes {stable_mosaic.version = 11 : i64} {
  func.func @_veckm_kernel(%arg0: i32, %arg1: i32, %arg2: memref<128x3xf32, #tpu.memory_space<vmem>>, %arg3: memref<3x128xf32, #tpu.memory_space<vmem>>, %arg4: memref<128x1xf32, #tpu.memory_space<vmem>>, %arg5: memref<1x128xf32, #tpu.memory_space<vmem>>, %arg6: memref<128x256xf32, #tpu.memory_space<vmem>>, %arg7: memref<128x256xf32, #tpu.memory_space<vmem>>, %arg8: memref<128x256xf32, #tpu.memory_space<vmem>>) attributes {dimension_semantics = [#tpu.dimension_semantics<parallel>, #tpu.dimension_semantics<arbitrary>], iteration_bounds = array<i64: 4, 4>, scalar_prefetch = 0 : i64, scratch_operands = 0 : i64, tpu.core_type = #tpu.core_type<tc>, window_params = [{transform_indices = @transform_0, window_bounds = array<i64: 128, 3>}, {transform_indices = @transform_1, window_bounds = array<i64: 3, 128>}, {transform_indices = @transform_2, window_bounds = array<i64: 128, 1>}, {transform_indices = @transform_3, window_bounds = array<i64: 1, 128>}, {transform_indices = @transform_4, window_bounds = array<i64: 128, 256>}, {transform_indices = @transform_5, window_bounds = array<i64: 128, 256>}, {transform_indices = @transform_6, window_bounds = array<i64: 128, 256>}]} {
    %c0_i32 = arith.constant 0 : i32
    %0 = arith.cmpi eq, %arg1, %c0_i32 : i32
    %1 = arith.extui %0 : i1 to i32
    %c0_i32_0 = arith.constant 0 : i32
    %2 = arith.cmpi ne, %1, %c0_i32_0 : i32
    scf.if %2 {
      %cst_12 = arith.constant 0.000000e+00 : f32
      %37 = vector.broadcast %cst_12 : f32 to vector<128x256xf32>
      %c0_13 = arith.constant 0 : index
      %c0_14 = arith.constant 0 : index
      %38 = vector.load %arg8[%c0_13, %c0_14] : memref<128x256xf32, #tpu.memory_space<vmem>>, vector<128x256xf32>
      tpu.vector_store %arg8[%c0_13, %c0_14], %37 {strides = array<i32>} : memref<128x256xf32, #tpu.memory_space<vmem>>, vector<128x256xf32>,
    } else {
    }
    %c0 = arith.constant 0 : index
    %c0_1 = arith.constant 0 : index
    %3 = vector.load %arg2[%c0, %c0_1] : memref<128x3xf32, #tpu.memory_space<vmem>>, vector<128x3xf32>
    %c0_2 = arith.constant 0 : index
    %c0_3 = arith.constant 0 : index
    %4 = vector.load %arg3[%c0_2, %c0_3] : memref<3x128xf32, #tpu.memory_space<vmem>>, vector<3x128xf32>
    %c0_4 = arith.constant 0 : index
    %c0_5 = arith.constant 0 : index
    %5 = vector.load %arg6[%c0_4, %c0_5] : memref<128x256xf32, #tpu.memory_space<vmem>>, vector<128x256xf32>
    %6 = vector.extract_strided_slice %3 {offsets = [0, 0], sizes = [128, 1], strides = [1, 1]} : vector<128x3xf32> to vector<128x1xf32>
    %7 = vector.extract_strided_slice %4 {offsets = [0, 0], sizes = [1, 128], strides = [1, 1]} : vector<3x128xf32> to vector<1x128xf32>
    %8 = vector.broadcast %6 : vector<128x1xf32> to vector<128x128xf32>
    %9 = vector.broadcast %7 : vector<1x128xf32> to vector<128x128xf32>
    %10 = arith.subf %8, %9 : vector<128x128xf32>
    %11 = arith.mulf %10, %10 : vector<128x128xf32>
    %12 = vector.extract_strided_slice %3 {offsets = [0, 1], sizes = [128, 1], strides = [1, 1]} : vector<128x3xf32> to vector<128x1xf32>
    %13 = vector.extract_strided_slice %4 {offsets = [1, 0], sizes = [1, 128], strides = [1, 1]} : vector<3x128xf32> to vector<1x128xf32>
    %14 = vector.broadcast %12 : vector<128x1xf32> to vector<128x128xf32>
    %15 = vector.broadcast %13 : vector<1x128xf32> to vector<128x128xf32>
    %16 = arith.subf %14, %15 : vector<128x128xf32>
    %17 = arith.mulf %16, %16 : vector<128x128xf32>
    %18 = arith.addf %11, %17 : vector<128x128xf32>
    %19 = vector.extract_strided_slice %3 {offsets = [0, 2], sizes = [128, 1], strides = [1, 1]} : vector<128x3xf32> to vector<128x1xf32>
    %20 = vector.extract_strided_slice %4 {offsets = [2, 0], sizes = [1, 128], strides = [1, 1]} : vector<3x128xf32> to vector<1x128xf32>
    %21 = vector.broadcast %19 : vector<128x1xf32> to vector<128x128xf32>
    %22 = vector.broadcast %20 : vector<1x128xf32> to vector<128x128xf32>
    %23 = arith.subf %21, %22 : vector<128x128xf32>
    %24 = arith.mulf %23, %23 : vector<128x128xf32>
    %25 = arith.addf %18, %24 : vector<128x128xf32>
    %cst = arith.constant 9.000000e-02 : f32
    %26 = vector.broadcast %cst : f32 to vector<128x128xf32>
    %27 = arith.cmpf olt, %25, %26 : vector<128x128xf32>
    %28 = arith.extui %27 : vector<128x128xi1> to vector<128x128xi32>
    %29 = arith.sitofp %28 : vector<128x128xi32> to vector<128x128xf32>
    %c0_6 = arith.constant 0 : index
    %c0_7 = arith.constant 0 : index
    %30 = vector.load %arg8[%c0_6, %c0_7] : memref<128x256xf32, #tpu.memory_space<vmem>>, vector<128x256xf32>
    %cst_8 = arith.constant dense<0.000000e+00> : vector<128x256xf32>
    %31 = tpu.matmul %29, %5, %cst_8 {dimension_numbers = #tpu.dot_dimension_numbers<[1], [0], [0], [1], [0, 0, 1, 1], [], []>} : vector<128x128xf32>, vector<128x256xf32>, vector<128x256xf32> -> vector<128x256xf32>
    %32 = arith.addf %30, %31 : vector<128x256xf32>
    %c0_9 = arith.constant 0 : index
    %c0_10 = arith.constant 0 : index
    %33 = vector.load %arg8[%c0_9, %c0_10] : memref<128x256xf32, #tpu.memory_space<vmem>>, vector<128x256xf32>
    tpu.vector_store %arg8[%c0_9, %c0_10], %32 {strides = array<i32>} : memref<128x256xf32, #tpu.memory_space<vmem>>, vector<128x256xf32>,
    %c3_i32 = arith.constant 3 : i32
    %34 = arith.cmpi eq, %arg1, %c3_i32 : i32
    %35 = arith.extui %34 : i1 to i32
    %c0_i32_11 = arith.constant 0 : i32
    %36 = arith.cmpi ne, %35, %c0_i32_11 : i32
    scf.if %36 {
      %c0_12 = arith.constant 0 : index
      %c0_13 = arith.constant 0 : index
      %37 = vector.load %arg7[%c0_12, %c0_13] : memref<128x256xf32, #tpu.memory_space<vmem>>, vector<128x256xf32>
      %38 = vector.extract_strided_slice %37 {offsets = [0, 0], sizes = [128, 128], strides = [1, 1]} : vector<128x256xf32> to vector<128x128xf32>
      %39 = vector.extract_strided_slice %37 {offsets = [0, 128], sizes = [128, 128], strides = [1, 1]} : vector<128x256xf32> to vector<128x128xf32>
      %c0_14 = arith.constant 0 : index
      %c0_15 = arith.constant 0 : index
      %40 = vector.load %arg8[%c0_14, %c0_15] : memref<128x256xf32, #tpu.memory_space<vmem>>, vector<128x256xf32>
      %41 = vector.extract_strided_slice %40 {offsets = [0, 0], sizes = [128, 128], strides = [1, 1]} : vector<128x256xf32> to vector<128x128xf32>
      %42 = vector.extract_strided_slice %40 {offsets = [0, 128], sizes = [128, 128], strides = [1, 1]} : vector<128x256xf32> to vector<128x128xf32>
      %43 = arith.mulf %41, %38 : vector<128x128xf32>
      %44 = arith.mulf %42, %39 : vector<128x128xf32>
      %45 = arith.addf %43, %44 : vector<128x128xf32>
      %46 = arith.mulf %42, %38 : vector<128x128xf32>
      %47 = arith.mulf %41, %39 : vector<128x128xf32>
      %48 = arith.subf %46, %47 : vector<128x128xf32>
      %49 = arith.mulf %45, %45 : vector<128x128xf32>
      %50 = arith.mulf %48, %48 : vector<128x128xf32>
      %51 = arith.addf %49, %50 : vector<128x128xf32>
      %cst_16 = arith.constant dense<0.000000e+00> : vector<128xf32>
      %52 = vector.multi_reduction <add>, %51, %cst_16 [1] : vector<128x128xf32> to vector<128xf32>
      %53 = vector.shape_cast %52 : vector<128xf32> to vector<128x1xf32>
      %54 = math.rsqrt %53 : vector<128x1xf32>
      %cst_17 = arith.constant 11.3137083 : f32
      %55 = vector.broadcast %cst_17 : f32 to vector<128x1xf32>
      %56 = arith.mulf %55, %54 : vector<128x1xf32>
      %57 = tpu.concatenate %45, %48 in 1 : vector<128x128xf32>, vector<128x128xf32> -> vector<128x256xf32>
      %58 = vector.broadcast %56 : vector<128x1xf32> to vector<128x256xf32>
      %59 = arith.mulf %57, %58 : vector<128x256xf32>
      %c0_18 = arith.constant 0 : index
      %c0_19 = arith.constant 0 : index
      %60 = vector.load %arg8[%c0_18, %c0_19] : memref<128x256xf32, #tpu.memory_space<vmem>>, vector<128x256xf32>
      tpu.vector_store %arg8[%c0_18, %c0_19], %59 {strides = array<i32>} : memref<128x256xf32, #tpu.memory_space<vmem>>, vector<128x256xf32>,
    } else {
    }
    return
  }
  func.func @transform_0(%arg0: i32, %arg1: i32) -> (i32, i32) {
    %c0_i32 = arith.constant 0 : i32
    %c0_i32_0 = arith.constant 0 : i32
    return %arg0, %c0_i32 : i32, i32
  }
  func.func @transform_1(%arg0: i32, %arg1: i32) -> (i32, i32) {
    %c0_i32 = arith.constant 0 : i32
    %c0_i32_0 = arith.constant 0 : i32
    return %c0_i32, %arg1 : i32, i32
  }
  func.func @transform_2(%arg0: i32, %arg1: i32) -> (i32, i32) {
    %c0_i32 = arith.constant 0 : i32
    %c0_i32_0 = arith.constant 0 : i32
    return %arg0, %c0_i32 : i32, i32
  }
  func.func @transform_3(%arg0: i32, %arg1: i32) -> (i32, i32) {
    %c0_i32 = arith.constant 0 : i32
    %c0_i32_0 = arith.constant 0 : i32
    return %c0_i32, %arg1 : i32, i32
  }
  func.func @transform_4(%arg0: i32, %arg1: i32) -> (i32, i32) {
    %c0_i32 = arith.constant 0 : i32
    %c0_i32_0 = arith.constant 0 : i32
    return %arg1, %c0_i32 : i32, i32
  }
  func.func @transform_5(%arg0: i32, %arg1: i32) -> (i32, i32) {
    %c0_i32 = arith.constant 0 : i32
    %c0_i32_0 = arith.constant 0 : i32
    return %arg0, %c0_i32 : i32, i32
  }
  func.func @transform_6(%arg0: i32, %arg1: i32) -> (i32, i32) {
    %c0_i32 = arith.constant 0 : i32
    %c0_i32_0 = arith.constant 0 : i32
    return %arg0, %c0_i32 : i32, i32
  }
}

</mosaic_0001>

<bundles_post_ra>
// kernel: tpu_custom_call.1
= control target key start
LH: loop header
LB: loop body
LE: loop exit
PB: predicated region body
PF: predicated region fallthrough
CT: control target
= control target key end

     0   :  { %s2842_s0 = inlined_call_operand.vmem [shape: f32[512,3], index: 0, kind: input, shape index: {}]   ;;  %s2843_s1 = inlined_call_operand.vmem [shape: f32[3,512], index: 1, kind: input, shape index: {}]   ;;  %s2844_s2 = inlined_call_operand.vmem [shape: f32[512,1], index: 2, kind: input, shape index: {}]   ;;  %s2845_s3 = inlined_call_operand.vmem [shape: f32[1,512], index: 3, kind: input, shape index: {}]   ;;  %s2846_s4 = inlined_call_operand.vmem [shape: f32[512,256], index: 4, kind: input, shape index: {}]   ;;  %s2847_s5 = inlined_call_operand.hbm [shape: f32[512,256], index: 5, kind: input, shape index: {}]   ;;  %s2848_s6 = inlined_call_operand.hbm [shape: f32[512,256], index: 6, kind: output, shape index: {}]  }
   0x1   :  { %2853 = sst [smem:[#allocation12_spill]] %s2847_s5 }
   0x2   :  { %11 = vsyncpa [#allocation3], 0 }
   0x3   :  { %13 = vsyncpa [#allocation3 + $0x1], 0 }
   0x4   :  { %14 = vsyncpa [#allocation4], 0 }
   0x5   :  { %16 = vsyncpa [#allocation4 + $0x1], 0  ;;  %s2051_s21 = smov 0   ;;  %s2053_s22 = smov 0  }
   0x6   :  { %s2055_s2 = smov 0   ;;  %s2057_s3 = smov 0  }
   0x7   :  { %s2059_s23 = smov 0   ;;  %s2061_s24 = smov 0  }
   0x8   :  { %s2063_s25 = smov 0   ;;  %s2065_s26 = smov 0  }
   0x9 LB: > { %2854 = sst [smem:[#allocation8_spill]] %s1994_s24  ;;  %s1619_s27 = sadd.s32 4294967295, %s2002_s26   ;;  %s2002_s26 = sphi %s2065_s26, %s22_s26   ;;  %s1998_s25 = sphi %s2063_s25, %s2870_s25   ;;  %s1994_s24 = sphi %s2061_s24, %s2869_s24   ;;  %s1990_s23 = sphi %s2059_s23, %s2868_s23   ;;  %s1986_s3 = sphi %s2057_s3, %s2867_s3   ;;  %s1982_s2 = sphi %s2055_s2, %s2873_s2   ;;  %s1978_s22 = sphi %s2053_s22, %s2872_s22   ;;  %s1974_s21 = sphi %s2051_s21, %s2871_s21  }
   0xa   : > { %2855 = sst [smem:[#allocation9_spill]] %s1998_s25  ;;  %s1620_s28 = sadd.s32 4294967294, %s2002_s26  }
   0xb   : > { %s31_s29 = sadd.s32 1, %s1994_s24  ;;  %s34_s30 = sadd.s32 1, %s1998_s25 }
   0xc   : > { %p32_p0 = scmp.ge.s32.totalorder %s31_s29, 4  ;;  %s171_s7 = sadd.s32 1, %s1982_s2 }
   0xd   : > { %p178_p1 = scmp.ne.s32.totalorder %s1982_s2, %s1978_s22  ;;  %p179_p2 = scmp.eq.s32.totalorder %s2002_s26, 0 }
   0xe   : > { %s2875_s29 = smov (%p32_p0, %s31_s29), 0  ;;  %s2877_s30 = smov (!%p32_p0, %s34_s30), %s1998_s25 }
   0xf   : > { %2856 = sst [smem:[#allocation10_spill]] %s2875_s29  ;;  %p2102_p3 = por %p179_p2, %p178_p1 }
  0x10   : > { %p184_p4 = scmp.ne.s32.totalorder %s1978_s22, %s1974_s21  ;;  %p36_p5 = scmp.ge.s32.totalorder %s2877_s30, 4 }
  0x11   : > { %p185_p6 = scmp.eq.s32.totalorder %s1619_s27, 0  ;;  %p208_p7 = scmp.eq.s32.totalorder %s1619_s27, 15 }
  0x12   : > { %p214_p8 = scmp.eq.s32.totalorder %s1620_s28, 15  ;;  %s2879_s30 = smov (%p36_p5, %s2877_s30), 0 }
  0x13   : > { %2858 = sst [smem:[#allocation11_spill]] %s2879_s30  ;;  %p2110_p9 = por %p185_p6, %p184_p4 }
  0x14   : > { %p2114_p10 = por %p208_p7, %p178_p1  ;;  %s168_s11 = ssub.s32 %s1998_s25, %s2879_s30 }
  0x15   : > { %p2120_p11 = por %p214_p8, %p184_p4  ;;  %p169_p12 = scmp.eq.s32.totalorder %s168_s11, 0 }
  0x16   : > { %s2860_s10 = scalar_select %p2114_p10, 1, 0 }
  0x17   : > { %s2861_s12 = scalar_select %p2120_p11, 1, 0 }
  0x18   : > { %p1741_p13 = scmp.lt.s32.totalorder %s2002_s26, 16  ;;  %s275_s13 = sand.u32 1, %s1982_s2  }
  0x19   : > { %s2127_s14 = scalar_select %p169_p12, %s1982_s2, %s171_s7  }
  0x1a   : > { %s1623_s15 = sshll.u32 %s275_s13, 8  ;;  %s1677_s16 = sshll.u32 %s1998_s25, 12 }
  0x1b   : > { %s2862_s5 = sld [smem:[#allocation12_spill]]  ;;  %s279_s20 = scalar_lea.vmem [#allocation2], %s1623_s15 }
  0x1c   : > { %s287_s27 = sshll.u32 %s279_s20, 4  ;;  %p2139_p0 = pnand %p1741_p13, %p2102_p3  ;;  %s2135_s27 = int_to_ptr.vmem [resolvable:$true] %s287_s27 }
  0x1d   : > { %s2144_s7 = scalar_lea.sflag [#allocation3], %s275_s13 }
  0x1e   : > { %p1876_p4 = pneg %p2139_p0 }
  0x21   : > { %s2133_s19 = scalar_lea.hbm %s2862_s5, %s1677_s16  ;;  %s1879_s8 = scalar_lea.hbm %s2862_s5, 16384 }
  0x22   : > { %s1874_s11 = scalar_lea.hbm %s2133_s19, 4096  ;;  %p1880_p3 = scmp.lt.u32.totalorder %s2133_s19, %s2862_s5 }
  0x23   : > { %p1875_p2 = scmp.ne.s32.totalorder %s2133_s19, %s1874_s11  ;;  %p1881_p7 = scmp.lt.u32.totalorder %s1879_s8, %s1874_s11 }
  0x24   : > { %p1883_p12 = scmp.lt.u32.totalorder %s1874_s11, %s2133_s19 }
  0x25   : > { %p1877_p5 = pnand %p1876_p4, %p1875_p2  ;;  %p1882_p8 = por %p1881_p7, %p1880_p3 }
  0x27   : > { %p1878_p6 = pneg %p1877_p5  ;;  %p1884_p13 = por %p1883_p12, %p1882_p8 }
  0x29   : > { %p1885_p1 = pnand %p1884_p13, %p1878_p6 }
  0x2b   : > { %1888 = shalt.err (!%p1885_p1)
}
  0x2c   : > { %s1889_s13 = scalar_lea.vmem %s2135_s27, 4096  ;;  %s2004_s20 = smov [#allocation2]  }
  0x2d   : > { %p1890_p2 = scmp.ne.s32.totalorder %s2135_s27, %s1889_s13  ;;  %s1894_s15 = sshll.u32 %s2004_s20, 4  ;;  %s1895_s15 = int_to_ptr.vmem [resolvable:$false] %s1894_s15 }
  0x2e   : > { %s1896_s16 = scalar_lea.vmem %s1895_s15, 8192  ;;  %p1897_p10 = scmp.lt.s32.totalorder %s2135_s27, %s1895_s15 }
  0x2f   : > { %p1892_p5 = pnand %p1890_p2, %p1876_p4  ;;  %p1898_p3 = scmp.lt.s32.totalorder %s1896_s16, %s1889_s13 }
  0x31   : > { %p1893_p11 = pneg %p1892_p5  ;;  %p1899_p7 = por %p1898_p3, %p1897_p10 }
  0x33   : > { %p1900_p8 = pnand %p1899_p7, %p1893_p11 }
  0x35   : > { %1903 = shalt.err (!%p1900_p8)
}
  0x36   : > { %s2005_s11 = smov 256   ;;  %s2006_s8 = smov 16  }
  0x37   : > { %1736 = dma.hbm_to_vmem [thread:$0]  (!%p2139_p0), %s2133_s19, 4096, %s2135_s27, %s2144_s7, %s2005_s11, %s2005_s11, %s2006_s8  }
  0x38   : > { %p295_p1 = scmp.lt.s32.totalorder %s2002_s26, 17  ;;  %p2864_p4 = scmp.ge.s32.totalorder %s2002_s26, 1 }
  0x3a   : > { %p296_p6 = pnand %p2864_p4, %p295_p1 }
  0x3b   : > { %s2176_s17 = sand.u32 (!%p296_p6), 1, %s1978_s22  }
  0x3c   : > { %299 = sbr.rel (%p296_p6) target bundleno = 798 (0x31e), region = 44  ;;  %s1628_s18 = sshll.u32 (!%p296_p6), %s2176_s17, 8 }
  0x3d   : > { %s302_s13 = scalar_lea.sflag (!%p296_p6), [#allocation3], %s2176_s17  ;;  %s2180_s20 = scalar_lea.vmem (!%p296_p6), [#allocation2], %s1628_s18 }
  0x43   : > { %1965 = dma.done.wait (%p2110_p9), %s302_s13, 4096  }
  0x44   : > { %1967 = vsyncadd (%p2110_p9), %s302_s13, 4294963200  ;;  %s1630_s19 = sshll.u32 %s1990_s23, 4  ;;  %p363_p11 = scmp.lt.s32.totalorder %s1986_s3, 3 }
  0x45   : > { %p358_p10 = scmp.lt.s32.totalorder %s1630_s19, 63  ;;  %s1633_s27 = sshll.u32 %s1986_s3, 4 }
  0x46   : > { %s364_s28 = scalar_select %p363_p11, %s1986_s3, 3 }
  0x47   : > { %s2881_s19 = smov (!%p358_p10, %s1630_s19), 63  ;;  %p377_p0 = scmp.lt.s32.totalorder %s1633_s27, 63 }
  0x48   : > { %s1631_s7 = sshll.u32 %s2881_s19, 3  ;;  %s1632_s8 = sshll.u32 %s364_s28, 2 }
  0x49   : > { %s2193_s11 = scalar_lea.vmem %s2842_s0, %s1631_s7  ;;  %s2198_s5 = scalar_lea.vmem %s2843_s1, %s1632_s8 }
  0x4a   : > { %s2883_s27 = smov (!%p377_p0, %s1633_s27), 63  ;;  %s2205_s19 = scalar_lea.vmem [#allocation5], %s1628_s18 }
  0x4b   : > { %s1678_s30 = sshll.u32 %s2883_s27, 4  ;;  %p1636_p9 = scmp.ne.s32.totalorder %s1986_s3, 0 }
  0x4c   : > { %s2203_s24 = scalar_lea.vmem %s2846_s4, %s1678_s30  ;;  %v2007_v0 = vmov (!%p1636_p9), 0.0  }
  0x4d   : > { %388 = sbr.rel (%p1636_p9) target bundleno = 93 (0x5d), region = 52  ;;  %389 = vst [vmem:[%s2205_s19] sm:$0xff] (!%p1636_p9), %v2007_v0  ;;  %390 = vst [vmem:[%s2205_s19 + $0x8] sm:$0xff] (!%p1636_p9), %v2007_v0 }
  0x4e   : > { %391 = vst [vmem:[%s2205_s19 + $0x10] sm:$0xff] (!%p1636_p9), %v2007_v0  ;;  %392 = vst [vmem:[%s2205_s19 + $0x18] sm:$0xff] (!%p1636_p9), %v2007_v0 }
  0x4f   : > { %393 = vst [vmem:[%s2205_s19 + $0x20] sm:$0xff] (!%p1636_p9), %v2007_v0  ;;  %394 = vst [vmem:[%s2205_s19 + $0x28] sm:$0xff] (!%p1636_p9), %v2007_v0 }
  0x50   : > { %395 = vst [vmem:[%s2205_s19 + $0x30] sm:$0xff] (!%p1636_p9), %v2007_v0  ;;  %396 = vst [vmem:[%s2205_s19 + $0x38] sm:$0xff] (!%p1636_p9), %v2007_v0 }
  0x51   : > { %397 = vst [vmem:[%s2205_s19 + $0x40] sm:$0xff] (!%p1636_p9), %v2007_v0  ;;  %398 = vst [vmem:[%s2205_s19 + $0x48] sm:$0xff] (!%p1636_p9), %v2007_v0 }
  0x52   : > { %399 = vst [vmem:[%s2205_s19 + $0x50] sm:$0xff] (!%p1636_p9), %v2007_v0  ;;  %400 = vst [vmem:[%s2205_s19 + $0x58] sm:$0xff] (!%p1636_p9), %v2007_v0 }
  0x53   : > { %401 = vst [vmem:[%s2205_s19 + $0x60] sm:$0xff] (!%p1636_p9), %v2007_v0  ;;  %402 = vst [vmem:[%s2205_s19 + $0x68] sm:$0xff] (!%p1636_p9), %v2007_v0 }
  0x54   : > { %403 = vst [vmem:[%s2205_s19 + $0x70] sm:$0xff] %v2007_v0  ;;  %404 = vst [vmem:[%s2205_s19 + $0x78] sm:$0xff] %v2007_v0 }
  0x55   : > { %405 = vst [vmem:[%s2205_s19 + $0x80] sm:$0xff] %v2007_v0  ;;  %406 = vst [vmem:[%s2205_s19 + $0x88] sm:$0xff] %v2007_v0 }
  0x56   : > { %407 = vst [vmem:[%s2205_s19 + $0x90] sm:$0xff] %v2007_v0  ;;  %408 = vst [vmem:[%s2205_s19 + $0x98] sm:$0xff] %v2007_v0 }
  0x57   : > { %409 = vst [vmem:[%s2205_s19 + $0xa0] sm:$0xff] %v2007_v0  ;;  %410 = vst [vmem:[%s2205_s19 + $0xa8] sm:$0xff] %v2007_v0 }
  0x58   : > { %411 = vst [vmem:[%s2205_s19 + $0xb0] sm:$0xff] %v2007_v0  ;;  %412 = vst [vmem:[%s2205_s19 + $0xb8] sm:$0xff] %v2007_v0 }
  0x59   : > { %413 = vst [vmem:[%s2205_s19 + $0xc0] sm:$0xff] %v2007_v0  ;;  %414 = vst [vmem:[%s2205_s19 + $0xc8] sm:$0xff] %v2007_v0 }
  0x5a   : > { %415 = vst [vmem:[%s2205_s19 + $0xd0] sm:$0xff] %v2007_v0  ;;  %416 = vst [vmem:[%s2205_s19 + $0xd8] sm:$0xff] %v2007_v0 }
  0x5b   : > { %417 = vst [vmem:[%s2205_s19 + $0xe0] sm:$0xff] %v2007_v0  ;;  %418 = vst [vmem:[%s2205_s19 + $0xe8] sm:$0xff] %v2007_v0 }
  0x5c   : > { %419 = vst [vmem:[%s2205_s19 + $0xf0] sm:$0xff] %v2007_v0  ;;  %420 = vst [vmem:[%s2205_s19 + $0xf8] sm:$0xff] %v2007_v0 }
  0x5d PF: > { %v2241_v1 = vld [vmem:[%s2193_s11] sm:$0xff]  ;;  %v2008_v2 = vmov 1   ;;  %v2009_v3 = vmov 0   ;;  %v439_v5 = vld [vmem:[%s2203_s24 + $0x8] sm:$0xff]  ;;  %v441_v6 = vld [vmem:[%s2203_s24 + $0x18] sm:$0xff]  ;;  %v2010_v20 = vmov 2  }
  0x5e   : > { %1818 = vset.pattern.permute.xlu1 %v2008_v2  ;;  %1817 = vset.pattern.permute.xlu0 %v2009_v3  ;;  %v429_v4 = vld [vmem:[%s2193_s11 + $0x40] sm:$0xff]  ;;  %v2252_v8 = vld [vmem:[%s2193_s11 + $0x48] sm:$0xff]  ;;  %v1681_v9 = vpack.c.bf16 %v441_v6, %v439_v5  ;;  %v440_v10 = vld [vmem:[%s2203_s24 + $0x10] sm:$0xff]  ;;  %v2011_v36 = vmov 0.0   ;;  %p1669_p12 = scmp.ne.s32.totalorder %s1986_s3, 3 }
  0x5f   : > { %587 = vperm.xlu1 %1818, %v2241_v1   ;;  %472 = vperm.xlu0 %1817, %v2241_v1   ;;  %v438_v7 = vld [vmem:[%s2203_s24] sm:$0xff]  ;;  %v443_v11 = vld [vmem:[%s2203_s24 + $0x28] sm:$0xff]  ;;  %v445_v13 = vld [vmem:[%s2203_s24 + $0x38] sm:$0xff] }
  0x60   : > { %v1683_v12 = vpack.c.bf16 %v440_v10, %v438_v7  ;;  %v442_v14 = vld [vmem:[%s2203_s24 + $0x20] sm:$0xff]  ;;  %v444_v15 = vld [vmem:[%s2203_s24 + $0x30] sm:$0xff]  ;;  %1713 = vmatprep.subr.bf16.mxu1 %v1681_v9  ;;  %v1685_v16 = vpack.c.bf16 %v445_v13, %v443_v11  ;;  %v447_v17 = vld [vmem:[%s2203_s24 + $0x48] sm:$0xff]  ;;  %1682 = vmatprep.subr.bf16.mxu0 %v1681_v9  ;;  %v550_v7 = vlaneseq }
  0x61   : > { %v449_v18 = vld [vmem:[%s2203_s24 + $0x58] sm:$0xff]  ;;  %v1687_v19 = vpack.c.bf16 %v444_v15, %v442_v14  ;;  %v446_v22 = vld [vmem:[%s2203_s24 + $0x40] sm:$0xff]  ;;  %v448_v23 = vld [vmem:[%s2203_s24 + $0x50] sm:$0xff]  ;;  %1010 = vmatprep.mubr.f32.mxu1 %v2011_v36  ;;  %962 = vmatprep.mubr.f32.mxu0 %v2011_v36 }
  0x62   : > { %1721 = vmatpush1.bf16.msra.mxu1 %v1683_v12  ;;  %1684 = vmatpush1.bf16.msra.mxu0 %v1683_v12  ;;  %v1689_v21 = vpack.c.bf16 %v449_v18, %v447_v17  ;;  %v2266_v24 = vld [vmem:[%s2193_s11 + $0x50] sm:$0xff]  ;;  %v451_v25 = vld [vmem:[%s2203_s24 + $0x68] sm:$0xff]  ;;  %v453_v26 = vld [vmem:[%s2203_s24 + $0x78] sm:$0xff]  ;;  %v1691_v28 = vpack.c.bf16 %v448_v23, %v446_v22 }
  0x63   : > { %619 = vperm.xlu1 %1818, %v429_v4   ;;  %512 = vperm.xlu0 %1817, %v429_v4   ;;  %v2271_v27 = vld [vmem:[%s2193_s11 + $0x8] sm:$0xff]  ;;  %v1693_v29 = vpack.c.bf16 %v453_v26, %v451_v25  ;;  %v450_v30 = vld [vmem:[%s2203_s24 + $0x60] sm:$0xff]  ;;  %v452_v31 = vld [vmem:[%s2203_s24 + $0x70] sm:$0xff] }
  0x64   : > { %1714 = vmatprep.subr.bf16.mxu1 %v1685_v16  ;;  %1686 = vmatprep.subr.bf16.mxu0 %v1685_v16  ;;  %v2278_v32 = vld [vmem:[%s2193_s11 + $0x58] sm:$0xff]  ;;  %v455_v33 = vld [vmem:[%s2203_s24 + $0x88] sm:$0xff]  ;;  %v1695_v35 = vpack.c.bf16 %v452_v31, %v450_v30  ;;  %v454_v38 = vld [vmem:[%s2203_s24 + $0x80] sm:$0xff] }
  0x65   : > { %v457_v34 = vld [vmem:[%s2203_s24 + $0x98] sm:$0xff]  ;;  %v456_v39 = vld [vmem:[%s2203_s24 + $0x90] sm:$0xff]  ;;  %v2288_v40 = vld [vmem:[%s2193_s11 + $0x60] sm:$0xff] }
  0x66   : > { %1722 = vmatpush1.bf16.msra.mxu1 %v1687_v19  ;;  %1688 = vmatpush1.bf16.msra.mxu0 %v1687_v19  ;;  %v1697_v37 = vpack.c.bf16 %v457_v34, %v455_v33  ;;  %v459_v41 = vld [vmem:[%s2203_s24 + $0xa8] sm:$0xff]  ;;  %v461_v42 = vld [vmem:[%s2203_s24 + $0xb8] sm:$0xff]  ;;  %v1699_v43 = vpack.c.bf16 %v456_v39, %v454_v38  ;;  %v458_v45 = vld [vmem:[%s2203_s24 + $0xa0] sm:$0xff] }
  0x67   : > { %1819 = vset.pattern.permute.xlu1 %v2010_v20  ;;  %517 = vperm.xlu0 %1817, %v2252_v8   ;;  %v1701_v44 = vpack.c.bf16 %v461_v42, %v459_v41  ;;  %v460_v46 = vld [vmem:[%s2203_s24 + $0xb0] sm:$0xff]  ;;  %v2299_v47 = vld [vmem:[%s2193_s11 + $0x68] sm:$0xff]  ;;  %v465_v49 = vld [vmem:[%s2203_s24 + $0xd8] sm:$0xff] }
  0x68   : > { %735 = vperm.xlu1 %1819, %v429_v4   ;;  %1715 = vmatprep.subr.bf16.mxu1 %v1689_v21  ;;  %v463_v48 = vld [vmem:[%s2203_s24 + $0xc8] sm:$0xff]  ;;  %v1703_v50 = vpack.c.bf16 %v460_v46, %v458_v45  ;;  %v462_v51 = vld [vmem:[%s2203_s24 + $0xc0] sm:$0xff]  ;;  %v464_v52 = vld [vmem:[%s2203_s24 + $0xd0] sm:$0xff] }
  0x69   : > { %1690 = vmatprep.subr.bf16.mxu0 %v1689_v21  ;;  %v2308_v53 = vld [vmem:[%s2193_s11 + $0x70] sm:$0xff]  ;;  %v1705_v54 = vpack.c.bf16 %v465_v49, %v463_v48  ;;  %v467_v55 = vld [vmem:[%s2203_s24 + $0xe8] sm:$0xff]  ;;  %v469_v56 = vld [vmem:[%s2203_s24 + $0xf8] sm:$0xff]  ;;  %v1707_v57 = vpack.c.bf16 %v464_v52, %v462_v51 }
  0x6a   : > { %1723 = vmatpush1.bf16.msra.mxu1 %v1691_v28  ;;  %1692 = vmatpush1.bf16.msra.mxu0 %v1691_v28  ;;  %v466_v58 = vld [vmem:[%s2203_s24 + $0xe0] sm:$0xff]  ;;  %v468_v59 = vld [vmem:[%s2203_s24 + $0xf0] sm:$0xff]  ;;  %v2318_v60 = vld [vmem:[%s2193_s11 + $0x78] sm:$0xff]  ;;  %v1709_v61 = vpack.c.bf16 %v469_v56, %v467_v55 }
  0x6b   : > { %522 = vperm.xlu0 %1817, %v2266_v24   ;;  %1716 = vmatprep.subr.bf16.mxu1 %v1693_v29  ;;  %v423_v62 = vld [vmem:[%s2193_s11 + $0x10] sm:$0xff]  ;;  %v1711_v63 = vpack.c.bf16 %v468_v59, %v466_v58  ;;  %v424_v0 = vld [vmem:[%s2193_s11 + $0x18] sm:$0xff]  ;;  %v425_v4 = vld [vmem:[%s2193_s11 + $0x20] sm:$0xff] }
  0x6c   : > { %1820 = vset.pattern.permute.xlu1 %v2009_v3  ;;  %1694 = vmatprep.subr.bf16.mxu0 %v1693_v29  ;;  %v427_v5 = vld [vmem:[%s2193_s11 + $0x30] sm:$0xff]  ;;  %v428_v6 = vld [vmem:[%s2193_s11 + $0x38] sm:$0xff]  ;;  %v437_v11 = vld [vmem:[%s2198_s5] sm:$0x7] }
  0x6d   : > { %477 = vperm.xlu1 %1820, %v2271_v27  }
  0x6e   : > { %1724 = vmatpush1.bf16.msra.mxu1 %v1695_v35  ;;  %1696 = vmatpush1.bf16.msra.mxu0 %v1695_v35 }
  0x6f   : > { %527 = vperm.xlu0 %1817, %v2278_v32   ;;  %1717 = vmatprep.subr.bf16.mxu1 %v1697_v37 }
  0x70   : > { %1698 = vmatprep.subr.bf16.mxu0 %v1697_v37 }
  0x71   : > { %1821 = vset.pattern.permute.xlu1 %v2008_v2 }
  0x72   : > { %591 = vperm.xlu1 %1821, %v2271_v27   ;;  %1725 = vmatpush1.bf16.msra.mxu1 %v1699_v43 }
  0x73   : > { %532 = vperm.xlu0 %1817, %v2288_v40   ;;  %1718 = vmatprep.subr.bf16.mxu1 %v1701_v44 }
  0x74   : > { %1700 = vmatpush1.bf16.msra.mxu0 %v1699_v43 }
  0x75   : > { %1702 = vmatprep.subr.bf16.mxu0 %v1701_v44 }
  0x76   : > { %623 = vperm.xlu1 %1821, %v2252_v8   ;;  %1726 = vmatpush1.bf16.msra.mxu1 %v1703_v50 }
  0x77   : > { %537 = vperm.xlu0 %1817, %v2299_v47   ;;  %1719 = vmatprep.subr.bf16.mxu1 %v1705_v54 }
  0x78   : > { %1704 = vmatpush1.bf16.msra.mxu0 %v1703_v50 }
  0x79   : > { %1706 = vmatprep.subr.bf16.mxu0 %v1705_v54 }
  0x7a   : > { %1822 = vset.pattern.permute.xlu1 %v2010_v20  ;;  %1727 = vmatpush1.bf16.msra.mxu1 %v1707_v57 }
  0x7b   : > { %739 = vperm.xlu1 %1822, %v2252_v8   ;;  %542 = vperm.xlu0 %1817, %v2308_v53   ;;  %v551_v8 = vshrl.u32 %v550_v7, 7 }
  0x7c   : > { %1720 = vmatprep.subr.bf16.mxu1 %v1709_v61  ;;  %1708 = vmatpush1.bf16.msra.mxu0 %v1707_v57 }
  0x7d   : > { %1710 = vmatprep.subr.bf16.mxu0 %v1709_v61  ;;  %v652_v9 = vsub.s32 1, %v551_v8  ;;  %v552_v10 = vsub.s32 0, %v551_v8  ;;  %v768_v14 = vsub.s32 2, %v551_v8 }
  0x7e   : > { %1728 = vmatpush1.bf16.msra.mxu1 %v1711_v63 }
  0x7f   : > { %1823 = vset.pattern.permute.xlu1 %v2009_v3  ;;  %547 = vperm.xlu0 %1817, %v2318_v60   ;;  %v2357_v15 = vrot.slane %v437_v11, %v652_v9  ;;  %v2359_v16 = vrot.slane %v437_v11, %v552_v10  ;;  %v2364_v22 = vrot.slane %v437_v11, %v768_v14 }
  0x80   : > { %482 = vperm.xlu1 %1823, %v423_v62   ;;  %1712 = vmatpush1.bf16.msra.mxu0 %v1711_v63 }
  0x83   : > { %1839 = vset.pattern.permute.xlu0 %v2010_v20 }
  0x84   : > { %1824 = vset.pattern.permute.xlu1 %v2008_v2  ;;  %703 = vperm.xlu0 %1839, %v2241_v1   ;;  %v426_v1 = vld [vmem:[%s2193_s11 + $0x28] sm:$0xff] }
  0x85   : > { %595 = vperm.xlu1 %1824, %v423_v62  }
  0x88   : > { %707 = vperm.xlu0 %1839, %v2271_v27  }
  0x89   : > { %627 = vperm.xlu1 %1824, %v2266_v24  }
  0x8c   : > { %711 = vperm.xlu0 %1839, %v423_v62  }
  0x8d   : > { %1825 = vset.pattern.permute.xlu1 %v2010_v20 }
  0x8e   : > { %743 = vperm.xlu1 %1825, %v2266_v24  }
  0x90   : > { %715 = vperm.xlu0 %1839, %v424_v0  }
  0x92   : > { %1826 = vset.pattern.permute.xlu1 %v2009_v3 }
  0x93   : > { %487 = vperm.xlu1 %1826, %v424_v0  }
  0x94   : > { %719 = vperm.xlu0 %1839, %v425_v4  }
  0x97   : > { %1827 = vset.pattern.permute.xlu1 %v2008_v2 }
  0x98   : > { %599 = vperm.xlu1 %1827, %v424_v0   ;;  %723 = vperm.xlu0 %1839, %v426_v1  }
  0x9c   : > { %631 = vperm.xlu1 %1827, %v2278_v32   ;;  %727 = vperm.xlu0 %1839, %v427_v5  }
  0xa0   : > { %1828 = vset.pattern.permute.xlu1 %v2010_v20  ;;  %731 = vperm.xlu0 %1839, %v428_v6  }
  0xa1   : > { %747 = vperm.xlu1 %1828, %v2278_v32   ;;  %v2012_v32 = vmov 1.0  }
  0xa5   : > { %1829 = vset.pattern.permute.xlu1 %v2009_v3 }
  0xa6   : > { %492 = vperm.xlu1 %1829, %v425_v4  }
  0xaa   : > { %1830 = vset.pattern.permute.xlu1 %v2008_v2 }
  0xab   : > { %603 = vperm.xlu1 %1830, %v425_v4  }
  0xaf   : > { %635 = vperm.xlu1 %1830, %v2288_v40  }
  0xb3   : > { %1831 = vset.pattern.permute.xlu1 %v2010_v20 }
  0xb4   : > { %751 = vperm.xlu1 %1831, %v2288_v40  }
  0xb8   : > { %1832 = vset.pattern.permute.xlu1 %v2009_v3 }
  0xb9   : > { %497 = vperm.xlu1 %1832, %v426_v1  }
  0xbd   : > { %1833 = vset.pattern.permute.xlu1 %v2008_v2 }
  0xbe   : > { %607 = vperm.xlu1 %1833, %v426_v1  }
  0xc2   : > { %639 = vperm.xlu1 %1833, %v2299_v47  }
  0xc6   : > { %1834 = vset.pattern.permute.xlu1 %v2010_v20 }
  0xc7   : > { %755 = vperm.xlu1 %1834, %v2299_v47  }
  0xcb   : > { %1835 = vset.pattern.permute.xlu1 %v2009_v3 }
  0xcc   : > { %502 = vperm.xlu1 %1835, %v427_v5  }
  0xd0   : > { %1836 = vset.pattern.permute.xlu1 %v2008_v2 }
  0xd1   : > { %611 = vperm.xlu1 %1836, %v427_v5  }
  0xd5   : > { %643 = vperm.xlu1 %1836, %v2308_v53  }
  0xd9   : > { %1837 = vset.pattern.permute.xlu1 %v2010_v20 }
  0xda   : > { %759 = vperm.xlu1 %1837, %v2308_v53  }
  0xde   : > { %1838 = vset.pattern.permute.xlu1 %v2009_v3  ;;  %v588_v12 = vpop.permute.xlu1 %587  ;;  %v473_v13 = vpop.permute.xlu0 %472 }
  0xdf   : > { %507 = vperm.xlu1 %1838, %v428_v6   ;;  %v654_v46 = vsub.f32 %v588_v12, %v2357_v15  ;;  %v554_v47 = vsub.f32 %v473_v13, %v2359_v16 }
  0xe1   : > { %v670_v51 = vmul.f32 %v654_v46, %v654_v46  ;;  %v570_v52 = vmul.f32 %v554_v47, %v554_v47 }
  0xe2   : > { %v620_v17 = vpop.permute.xlu1 %619  ;;  %v513_v18 = vpop.permute.xlu0 %512 }
  0xe3   : > { %v662_v19 = vsub.f32 %v620_v17, %v2357_v15  ;;  %v562_v21 = vsub.f32 %v513_v18, %v2359_v16  ;;  %1840 = vset.pattern.permute.xlu1 %v2008_v2  ;;  %v686_v58 = vadd.f32 %v670_v51, %v570_v52 }
  0xe4   : > { %615 = vperm.xlu1 %1840, %v428_v6  }
  0xe5   : > { %v678_v3 = vmul.f32 %v662_v19, %v662_v19  ;;  %v578_v23 = vmul.f32 %v562_v21, %v562_v21 }
  0xe6   : > { %v518_v24 = vpop.permute.xlu0 %517 }
  0xe7   : > { %v736_v25 = vpop.permute.xlu1 %735  ;;  %v694_v27 = vadd.f32 %v678_v3, %v578_v23  ;;  %v563_v35 = vsub.f32 %v518_v24, %v2359_v16 }
  0xe8   : > { %v778_v26 = vsub.f32 %v736_v25, %v2364_v22  ;;  %647 = vperm.xlu1 %1840, %v2318_v60  }
  0xe9   : > { %v579_v39 = vmul.f32 %v563_v35, %v563_v35 }
  0xea   : > { %v794_v28 = vmul.f32 %v778_v26, %v778_v26  ;;  %v523_v29 = vpop.permute.xlu0 %522 }
  0xeb   : > { %v564_v62 = vsub.f32 %v523_v29, %v2359_v16 }
  0xec   : > { %v810_v30 = vadd.f32 %v794_v28, %v694_v27  ;;  %1841 = vset.pattern.permute.xlu1 %v2010_v20  ;;  %v478_v31 = vpop.permute.xlu1 %477 }
  0xed   : > { %763 = vperm.xlu1 %1841, %v2318_v60   ;;  %v555_v55 = vsub.f32 %v478_v31, %v2359_v16  ;;  %v580_v11 = vmul.f32 %v564_v62, %v564_v62 }
  0xee   : > { %vm826_vm0 = vcmp.lt.f32.partialorder %v810_v30, 0.09  ;;  %v2370_v2 = vpop.permute.xlu0 %527 }
  0xef   : > { %1661 = vmatmul.mubr.msk.f32.vlgmr.msra.gmra.mrb[0].mxu1 %vm826_vm0, %v2012_v32  ;;  %v571_v0 = vmul.f32 %v555_v55, %v555_v55 }
  0xf0   : > { %1016 = vmatprep.mubr.f32.mxu1 %v2011_v36 }
  0xf1   : > { %v592_v33 = vpop.permute.xlu1 %591 }
  0xf2   : > { %v2374_v34 = vpop.permute.xlu0 %532  ;;  %v655_v53 = vsub.f32 %v592_v33, %v2357_v15 }
  0xf4   : > { %v671_v59 = vmul.f32 %v655_v53, %v655_v53 }
  0xf5   : > { %v624_v37 = vpop.permute.xlu1 %623 }
  0xf6   : > { %v663_v38 = vsub.f32 %v624_v37, %v2357_v15  ;;  %v2378_v20 = vpop.permute.xlu0 %537  ;;  %v687_v8 = vadd.f32 %v671_v59, %v571_v0 }
  0xf8   : > { %v679_v40 = vmul.f32 %v663_v38, %v663_v38 }
  0xfa   : > { %v740_v41 = vpop.permute.xlu1 %739  ;;  %v2380_v42 = vpop.permute.xlu0 %542  ;;  %v695_v44 = vadd.f32 %v679_v40, %v579_v39  ;;  %v565_v40 = vsub.f32 %v2370_v2, %v2359_v16 }
  0xfb   : > { %v779_v43 = vsub.f32 %v740_v41, %v2364_v22 }
  0xfc   : > { %v581_v46 = vmul.f32 %v565_v40, %v565_v40 }
  0xfd   : > { %v795_v45 = vmul.f32 %v779_v43, %v779_v43 }
  0xfe   : > { %v2385_v48 = vpop.permute.xlu0 %547 }
  0xff   : > { %v811_v49 = vadd.f32 %v795_v45, %v695_v44  ;;  %v483_v50 = vpop.permute.xlu1 %482 }
 0x100   : > { %v556_v4 = vsub.f32 %v483_v50, %v2359_v16 }
 0x101   : > { %vm827_vm1 = vcmp.lt.f32.partialorder %v811_v49, 0.09 }
 0x102   : > { %1662 = vmatmul.mubr.msk.f32.gmra.mrb[2].mxu1 %vm827_vm1, %v2012_v32  ;;  %v572_v13 = vmul.f32 %v556_v4, %v556_v4  ;;  %v566_v4 = vsub.f32 %v2374_v34, %v2359_v16 }
 0x103   : > { %v704_v54 = vpop.permute.xlu0 %703  ;;  %1022 = vmatprep.mubr.f32.mxu1 %v2011_v36 }
 0x104   : > { %v770_v56 = vsub.f32 %v704_v54, %v2364_v22  ;;  %v596_v57 = vpop.permute.xlu1 %595 }
 0x105   : > { %v656_v61 = vsub.f32 %v596_v57, %v2357_v15 }
 0x106   : > { %v786_v60 = vmul.f32 %v770_v56, %v770_v56 }
 0x107   : > { %v708_v63 = vpop.permute.xlu0 %707  ;;  %v672_v9 = vmul.f32 %v656_v61, %v656_v61 }
 0x108   : > { %v802_v1 = vadd.f32 %v786_v60, %v686_v58  ;;  %v771_v5 = vsub.f32 %v708_v63, %v2364_v22  ;;  %v628_v6 = vpop.permute.xlu1 %627 }
 0x109   : > { %v664_v7 = vsub.f32 %v628_v6, %v2357_v15  ;;  %v688_v21 = vadd.f32 %v672_v9, %v572_v13 }
 0x10a   : > { %v787_v10 = vmul.f32 %v771_v5, %v771_v5  ;;  %vm818_vm2 = vcmp.lt.f32.partialorder %v802_v1, 0.09 }
 0x10b   : > { %1653 = vmatmul.mubr.msk.f32.vlgmr.msra.gmra.mrb[0].mxu0 %vm818_vm2, %v2012_v32  ;;  %v712_v12 = vpop.permute.xlu0 %711  ;;  %v680_v17 = vmul.f32 %v664_v7, %v664_v7  ;;  %v582_v7 = vmul.f32 %v566_v4, %v566_v4 }
 0x10c   : > { %v803_v14 = vadd.f32 %v787_v10, %v687_v8  ;;  %v772_v18 = vsub.f32 %v712_v12, %v2364_v22  ;;  %968 = vmatprep.mubr.f32.mxu0 %v2011_v36 }
 0x10d   : > { %v744_v19 = vpop.permute.xlu1 %743  ;;  %v696_v24 = vadd.f32 %v680_v17, %v580_v11 }
 0x10e   : > { %v788_v3 = vmul.f32 %v772_v18, %v772_v18  ;;  %v780_v23 = vsub.f32 %v744_v19, %v2364_v22  ;;  %vm819_vm3 = vcmp.lt.f32.partialorder %v803_v14, 0.09 }
 0x10f   : > { %1654 = vmatmul.mubr.msk.f32.gmra.mrb[2].mxu0 %vm819_vm3, %v2012_v32  ;;  %v716_v29 = vpop.permute.xlu0 %715 }
 0x110   : > { %v804_v25 = vadd.f32 %v788_v3, %v688_v21  ;;  %v796_v26 = vmul.f32 %v780_v23, %v780_v23  ;;  %974 = vmatprep.mubr.f32.mxu0 %v2011_v36  ;;  %v773_v31 = vsub.f32 %v716_v29, %v2364_v22 }
 0x112   : > { %v812_v27 = vadd.f32 %v796_v26, %v696_v24  ;;  %v488_v28 = vpop.permute.xlu1 %487  ;;  %vm820_vm4 = vcmp.lt.f32.partialorder %v804_v25, 0.09  ;;  %v789_v39 = vmul.f32 %v773_v31, %v773_v31  ;;  %v567_v26 = vsub.f32 %v2378_v20, %v2359_v16 }
 0x113   : > { %1655 = vmatmul.mubr.msk.f32.gmra.mrb[4].mxu0 %vm820_vm4, %v2012_v32  ;;  %v557_v30 = vsub.f32 %v488_v28, %v2359_v16  ;;  %v720_v2 = vpop.permute.xlu0 %719 }
 0x114   : > { %vm828_vm5 = vcmp.lt.f32.partialorder %v812_v27, 0.09  ;;  %980 = vmatprep.mubr.f32.mxu0 %v2011_v36  ;;  %v774_v56 = vsub.f32 %v720_v2, %v2364_v22 }
 0x115   : > { %1663 = vmatmul.mubr.msk.f32.gmra.mrb[4].mxu1 %vm828_vm5, %v2012_v32  ;;  %v573_v37 = vmul.f32 %v557_v30, %v557_v30  ;;  %v583_v30 = vmul.f32 %v567_v26, %v567_v26  ;;  %v867_v26 = vld [vmem:[%s2205_s19 + $0x8] sm:$0xff] }
 0x116   : > { %1028 = vmatprep.mubr.f32.mxu1 %v2011_v36  ;;  %v790_v61 = vmul.f32 %v774_v56, %v774_v56 }
 0x117   : > { %v600_v33 = vpop.permute.xlu1 %599  ;;  %v724_v13 = vpop.permute.xlu0 %723 }
 0x118   : > { %v657_v35 = vsub.f32 %v600_v33, %v2357_v15  ;;  %v775_v14 = vsub.f32 %v724_v13, %v2364_v22 }
 0x11a   : > { %v673_v38 = vmul.f32 %v657_v35, %v657_v35  ;;  %v791_v3 = vmul.f32 %v775_v14, %v775_v14 }
 0x11b   : > { %v632_v41 = vpop.permute.xlu1 %631 }
 0x11c   : > { %v689_v43 = vadd.f32 %v673_v38, %v573_v37  ;;  %v665_v44 = vsub.f32 %v632_v41, %v2357_v15 }
 0x11e   : > { %v805_v45 = vadd.f32 %v789_v39, %v689_v43  ;;  %v681_v47 = vmul.f32 %v665_v44, %v665_v44  ;;  %v728_v39 = vpop.permute.xlu0 %727 }
 0x11f   : > { %v776_v41 = vsub.f32 %v728_v39, %v2364_v22  ;;  %v870_v39 = vld [vmem:[%s2205_s19 + $0x20] sm:$0xff] }
 0x120   : > { %v748_v49 = vpop.permute.xlu1 %747  ;;  %vm821_vm6 = vcmp.lt.f32.partialorder %v805_v45, 0.09  ;;  %v697_v51 = vadd.f32 %v681_v47, %v581_v46 }
 0x121   : > { %v781_v50 = vsub.f32 %v748_v49, %v2364_v22  ;;  %1656 = vmatmul.mubr.msk.f32.gmra.mrb[6].mxu0 %vm821_vm6, %v2012_v32  ;;  %v792_v47 = vmul.f32 %v776_v41, %v776_v41 }
 0x122   : > { %986 = vmatprep.mubr.f32.mxu0 %v2011_v36 }
 0x123   : > { %v797_v52 = vmul.f32 %v781_v50, %v781_v50 }
 0x125   : > { %v813_v53 = vadd.f32 %v797_v52, %v697_v51  ;;  %v493_v54 = vpop.permute.xlu1 %492  ;;  %v568_v51 = vsub.f32 %v2380_v42, %v2359_v16 }
 0x126   : > { %v558_v55 = vsub.f32 %v493_v54, %v2359_v16 }
 0x127   : > { %vm829_vm7 = vcmp.lt.f32.partialorder %v813_v53, 0.09  ;;  %v584_v2 = vmul.f32 %v568_v51, %v568_v51 }
 0x128   : > { %1664 = vmatmul.mubr.msk.f32.gmra.mrb[6].mxu1 %vm829_vm7, %v2012_v32  ;;  %v574_v59 = vmul.f32 %v558_v55, %v558_v55 }
 0x129   : > { %1034 = vmatprep.mubr.f32.mxu1 %v2011_v36 }
 0x12a   : > { %v604_v57 = vpop.permute.xlu1 %603 }
 0x12b   : > { %v658_v58 = vsub.f32 %v604_v57, %v2357_v15 }
 0x12d   : > { %v674_v60 = vmul.f32 %v658_v58, %v658_v58 }
 0x12e   : > { %v636_v62 = vpop.permute.xlu1 %635 }
 0x12f   : > { %v690_v63 = vadd.f32 %v674_v60, %v574_v59  ;;  %v666_v0 = vsub.f32 %v636_v62, %v2357_v15  ;;  %v732_v60 = vpop.permute.xlu0 %731 }
 0x130   : > { %v777_v62 = vsub.f32 %v732_v60, %v2364_v22 }
 0x131   : > { %v806_v1 = vadd.f32 %v790_v61, %v690_v63  ;;  %v682_v5 = vmul.f32 %v666_v0, %v666_v0 }
 0x133   : > { %v752_v6 = vpop.permute.xlu1 %751  ;;  %vm822_vm8 = vcmp.lt.f32.partialorder %v806_v1, 0.09  ;;  %v698_v9 = vadd.f32 %v682_v5, %v582_v7  ;;  %v793_v5 = vmul.f32 %v777_v62, %v777_v62 }
 0x134   : > { %v782_v8 = vsub.f32 %v752_v6, %v2364_v22  ;;  %1657 = vmatmul.mubr.msk.f32.gmra.mrb[8].mxu0 %vm822_vm8, %v2012_v32 }
 0x135   : > { %992 = vmatprep.mubr.f32.mxu0 %v2011_v36 }
 0x136   : > { %v798_v10 = vmul.f32 %v782_v8, %v782_v8  ;;  %v569_v8 = vsub.f32 %v2385_v48, %v2359_v16 }
 0x138   : > { %v814_v11 = vadd.f32 %v798_v10, %v698_v9  ;;  %v498_v12 = vpop.permute.xlu1 %497 }
 0x139   : > { %v559_v34 = vsub.f32 %v498_v12, %v2359_v16 }
 0x13a   : > { %vm830_vm9 = vcmp.lt.f32.partialorder %v814_v11, 0.09  ;;  %v585_v11 = vmul.f32 %v569_v8, %v569_v8  ;;  %v891_v8 = vld [vmem:[%s2205_s19 + $0xc8] sm:$0xff] }
 0x13b   : > { %1665 = vmatmul.mubr.msk.f32.gmra.mrb[8].mxu1 %vm830_vm9, %v2012_v32  ;;  %v575_v19 = vmul.f32 %v559_v34, %v559_v34 }
 0x13c   : > { %1040 = vmatprep.mubr.f32.mxu1 %v2011_v36 }
 0x13d   : > { %v608_v17 = vpop.permute.xlu1 %607 }
 0x13e   : > { %v659_v18 = vsub.f32 %v608_v17, %v2357_v15 }
 0x140   : > { %v675_v21 = vmul.f32 %v659_v18, %v659_v18 }
 0x141   : > { %v640_v23 = vpop.permute.xlu1 %639 }
 0x142   : > { %v691_v24 = vadd.f32 %v675_v21, %v575_v19  ;;  %v667_v25 = vsub.f32 %v640_v23, %v2357_v15  ;;  %v885_v21 = vld [vmem:[%s2205_s19 + $0x98] sm:$0xff] }
 0x144   : > { %v807_v27 = vadd.f32 %v791_v3, %v691_v24  ;;  %v683_v28 = vmul.f32 %v667_v25, %v667_v25  ;;  %v866_v25 = vld [vmem:[%s2205_s19] sm:$0xff] }
 0x146   : > { %v756_v29 = vpop.permute.xlu1 %755  ;;  %vm823_vm10 = vcmp.lt.f32.partialorder %v807_v27, 0.09  ;;  %v699_v33 = vadd.f32 %v683_v28, %v583_v30 }
 0x147   : > { %v783_v31 = vsub.f32 %v756_v29, %v2364_v22  ;;  %1658 = vmatmul.mubr.msk.f32.gmra.mrb[10].mxu0 %vm823_vm10, %v2012_v32 }
 0x148   : > { %998 = vmatprep.mubr.f32.mxu0 %v2011_v36 }
 0x149   : > { %v799_v35 = vmul.f32 %v783_v31, %v783_v31  ;;  %v868_v31 = vld [vmem:[%s2205_s19 + $0x10] sm:$0xff] }
 0x14b   : > { %v815_v37 = vadd.f32 %v799_v35, %v699_v33  ;;  %v503_v38 = vpop.permute.xlu1 %502  ;;  %v869_v33 = vld [vmem:[%s2205_s19 + $0x18] sm:$0xff] }
 0x14c   : > { %v560_v20 = vsub.f32 %v503_v38, %v2359_v16 }
 0x14d   : > { %vm831_vm11 = vcmp.lt.f32.partialorder %v815_v37, 0.09 }
 0x14e   : > { %1666 = vmatmul.mubr.msk.f32.gmra.mrb[10].mxu1 %vm831_vm11, %v2012_v32  ;;  %v576_v44 = vmul.f32 %v560_v20, %v560_v20 }
 0x14f   : > { %1046 = vmatprep.mubr.f32.mxu1 %v2011_v36 }
 0x150   : > { %v612_v40 = vpop.permute.xlu1 %611 }
 0x151   : > { %v660_v43 = vsub.f32 %v612_v40, %v2357_v15  ;;  %v871_v40 = vld [vmem:[%s2205_s19 + $0x28] sm:$0xff] }
 0x153   : > { %v676_v45 = vmul.f32 %v660_v43, %v660_v43  ;;  %v886_v43 = vld [vmem:[%s2205_s19 + $0xa0] sm:$0xff] }
 0x154   : > { %v644_v46 = vpop.permute.xlu1 %643 }
 0x155   : > { %v692_v49 = vadd.f32 %v676_v45, %v576_v44  ;;  %v668_v50 = vsub.f32 %v644_v46, %v2357_v15  ;;  %v887_v46 = vld [vmem:[%s2205_s19 + $0xa8] sm:$0xff] }
 0x157   : > { %v808_v52 = vadd.f32 %v792_v47, %v692_v49  ;;  %v684_v53 = vmul.f32 %v668_v50, %v668_v50 }
 0x159   : > { %v760_v54 = vpop.permute.xlu1 %759  ;;  %vm824_vm12 = vcmp.lt.f32.partialorder %v808_v52, 0.09  ;;  %v700_v56 = vadd.f32 %v684_v53, %v584_v2  ;;  %v872_v53 = vld [vmem:[%s2205_s19 + $0x30] sm:$0xff] }
 0x15a   : > { %v784_v55 = vsub.f32 %v760_v54, %v2364_v22  ;;  %1659 = vmatmul.mubr.msk.f32.gmra.mrb[12].mxu0 %vm824_vm12, %v2012_v32  ;;  %v873_v54 = vld [vmem:[%s2205_s19 + $0x38] sm:$0xff] }
 0x15b   : > { %1004 = vmatprep.mubr.f32.mxu0 %v2011_v36 }
 0x15c   : > { %v800_v57 = vmul.f32 %v784_v55, %v784_v55 }
 0x15e   : > { %v816_v58 = vadd.f32 %v800_v57, %v700_v56  ;;  %v508_v59 = vpop.permute.xlu1 %507 }
 0x15f   : > { %v561_v42 = vsub.f32 %v508_v59, %v2359_v16  ;;  %v883_v16 = vld [vmem:[%s2205_s19 + $0x88] sm:$0xff]  ;;  %v889_v59 = vld [vmem:[%s2205_s19 + $0xb8] sm:$0xff] }
 0x160   : > { %vm832_vm13 = vcmp.lt.f32.partialorder %v816_v58, 0.09  ;;  %v888_v58 = vld [vmem:[%s2205_s19 + $0xb0] sm:$0xff] }
 0x161   : > { %1667 = vmatmul.mubr.msk.f32.gmra.mrb[12].mxu1 %vm832_vm13, %v2012_v32  ;;  %v577_v0 = vmul.f32 %v561_v42, %v561_v42 }
 0x162   : > { %1052 = vmatprep.mubr.f32.mxu1 %v2011_v36 }
 0x163   : > { %v616_v61 = vpop.permute.xlu1 %615 }
 0x164   : > { %v661_v63 = vsub.f32 %v616_v61, %v2357_v15 }
 0x166   : > { %v677_v4 = vmul.f32 %v661_v63, %v661_v63  ;;  %v874_v63 = vld [vmem:[%s2205_s19 + $0x40] sm:$0xff] }
 0x167   : > { %v648_v1 = vpop.permute.xlu1 %647 }
 0x168   : > { %v693_v6 = vadd.f32 %v677_v4, %v577_v0  ;;  %v669_v7 = vsub.f32 %v648_v1, %v2357_v15  ;;  %v882_v15 = vld [vmem:[%s2205_s19 + $0x80] sm:$0xff]  ;;  %v875_v0 = vld [vmem:[%s2205_s19 + $0x48] sm:$0xff] }
 0x16a   : > { %v809_v9 = vadd.f32 %v793_v5, %v693_v6  ;;  %v685_v10 = vmul.f32 %v669_v7, %v669_v7  ;;  %v890_v7 = vld [vmem:[%s2205_s19 + $0xc0] sm:$0xff] }
 0x16c   : > { %v764_v36 = vpop.permute.xlu1 %763  ;;  %vm825_vm14 = vcmp.lt.f32.partialorder %v809_v9, 0.09  ;;  %v701_v13 = vadd.f32 %v685_v10, %v585_v11 }
 0x16d   : > { %v785_v12 = vsub.f32 %v764_v36, %v2364_v22  ;;  %1660 = vmatmul.mubr.msk.f32.gmra.mrb[14].mxu0 %vm825_vm14, %v2012_v32  ;;  %v884_v22 = vld [vmem:[%s2205_s19 + $0x90] sm:$0xff] }
 0x16f   : > { %v801_v34 = vmul.f32 %v785_v12, %v785_v12  ;;  %v876_v12 = vld [vmem:[%s2205_s19 + $0x50] sm:$0xff] }
 0x171   : > { %v817_v14 = vadd.f32 %v801_v34, %v701_v13  ;;  %v877_v13 = vld [vmem:[%s2205_s19 + $0x58] sm:$0xff] }
 0x173   : > { %vm833_vm15 = vcmp.lt.f32.partialorder %v817_v14, 0.09 }
 0x174   : > { %1668 = vmatmul.mubr.msk.f32.gmra.mrb[14].mxu1 %vm833_vm15, %v2012_v32 }
 0x1c2   : > { %v1012_v48 = vpop.f32.mrb[0].mxu1 }
 0x1c3   : > { %v1075_v17 = vadd.f32 %v1012_v48, %v882_v15  ;;  %v1014_v18 = vpop.f32.mrb[1].mxu1  ;;  %v892_v48 = vld [vmem:[%s2205_s19 + $0xd0] sm:$0xff] }
 0x1c4   : > { %v1076_v19 = vadd.f32 %v1014_v18, %v883_v16 }
 0x1c5   : > { %1107 = vst [vmem:[%s2205_s19 + $0x80] sm:$0xff] %v1075_v17  ;;  %v893_v17 = vld [vmem:[%s2205_s19 + $0xd8] sm:$0xff] }
 0x1c6   : > { %1108 = vst [vmem:[%s2205_s19 + $0x88] sm:$0xff] %v1076_v19 }
 0x1d5   : > { %v1018_v3 = vpop.f32.mrb[2].mxu1 }
 0x1d6   : > { %v1077_v23 = vadd.f32 %v1018_v3, %v884_v22  ;;  %v1020_v32 = vpop.f32.mrb[3].mxu1  ;;  %v878_v3 = vld [vmem:[%s2205_s19 + $0x60] sm:$0xff] }
 0x1d7   : > { %v1078_v24 = vadd.f32 %v1020_v32, %v885_v21 }
 0x1d8   : > { %1109 = vst [vmem:[%s2205_s19 + $0x90] sm:$0xff] %v1077_v23  ;;  %v879_v23 = vld [vmem:[%s2205_s19 + $0x68] sm:$0xff] }
 0x1d9   : > { %1110 = vst [vmem:[%s2205_s19 + $0x98] sm:$0xff] %v1078_v24 }
 0x1de   : > { %v964_v27 = vpop.f32.mrb[0].mxu0 }
 0x1df   : > { %v1059_v28 = vadd.f32 %v964_v27, %v866_v25  ;;  %v966_v29 = vpop.f32.mrb[1].mxu0  ;;  %v894_v27 = vld [vmem:[%s2205_s19 + $0xe0] sm:$0xff] }
 0x1e0   : > { %v1060_v30 = vadd.f32 %v966_v29, %v867_v26 }
 0x1e1   : > { %1091 = vst [vmem:[%s2205_s19] sm:$0xff] %v1059_v28  ;;  %v895_v28 = vld [vmem:[%s2205_s19 + $0xe8] sm:$0xff] }
 0x1e2   : > { %1092 = vst [vmem:[%s2205_s19 + $0x8] sm:$0xff] %v1060_v30  ;;  %v970_v35 = vpop.f32.mrb[2].mxu0 }
 0x1e3   : > { %v1061_v37 = vadd.f32 %v970_v35, %v868_v31  ;;  %v972_v38 = vpop.f32.mrb[3].mxu0  ;;  %v880_v35 = vld [vmem:[%s2205_s19 + $0x70] sm:$0xff] }
 0x1e4   : > { %v1062_v20 = vadd.f32 %v972_v38, %v869_v33 }
 0x1e5   : > { %1093 = vst [vmem:[%s2205_s19 + $0x10] sm:$0xff] %v1061_v37  ;;  %v881_v37 = vld [vmem:[%s2205_s19 + $0x78] sm:$0xff] }
 0x1e6   : > { %1094 = vst [vmem:[%s2205_s19 + $0x18] sm:$0xff] %v1062_v20  ;;  %v976_v41 = vpop.f32.mrb[4].mxu0 }
 0x1e7   : > { %v1063_v44 = vadd.f32 %v976_v41, %v870_v39  ;;  %v978_v45 = vpop.f32.mrb[5].mxu0  ;;  %v896_v41 = vld [vmem:[%s2205_s19 + $0xf0] sm:$0xff] }
 0x1e8   : > { %v1064_v47 = vadd.f32 %v978_v45, %v871_v40  ;;  %v1024_v49 = vpop.f32.mrb[4].mxu1 }
 0x1e9   : > { %1095 = vst [vmem:[%s2205_s19 + $0x20] sm:$0xff] %v1063_v44  ;;  %v1079_v50 = vadd.f32 %v1024_v49, %v886_v43  ;;  %v1026_v51 = vpop.f32.mrb[5].mxu1  ;;  %v897_v43 = vld [vmem:[%s2205_s19 + $0xf8] sm:$0xff]  ;;  %v1131_v49 = vld [vmem:[%s2180_s20 + $0x20] sm:$0xff] (!%p1669_p12) }
 0x1ea   : > { %1096 = vst [vmem:[%s2205_s19 + $0x28] sm:$0xff] %v1064_v47  ;;  %v1080_v52 = vadd.f32 %v1026_v51, %v887_v46 }
 0x1eb   : > { %1111 = vst [vmem:[%s2205_s19 + $0xa0] sm:$0xff] %v1079_v50  ;;  %v1132_v50 = vld [vmem:[%s2180_s20 + $0x28] sm:$0xff] (!%p1669_p12) }
 0x1ec   : > { %1112 = vst [vmem:[%s2205_s19 + $0xa8] sm:$0xff] %v1080_v52 }
 0x1f0   : > { %v1163_v51 = vld [vmem:[%s2205_s19 + $0x20] sm:$0xff] (!%p1669_p12) }
 0x1f1   : > { %v1164_v52 = vld [vmem:[%s2205_s19 + $0x28] sm:$0xff] (!%p1669_p12) }
 0x1f4   : > { %v982_v2 = vpop.f32.mrb[6].mxu0 }
 0x1f5   : > { %v1065_v55 = vadd.f32 %v982_v2, %v872_v53  ;;  %v984_v56 = vpop.f32.mrb[7].mxu0  ;;  %v1193_v53 = vmul.f32 (!%p1669_p12), %v1163_v51, %v1131_v49  ;;  %v1127_v2 = vld [vmem:[%s2180_s20] sm:$0xff] (!%p1669_p12) }
 0x1f6   : > { %v1066_v57 = vadd.f32 %v984_v56, %v873_v54  ;;  %v1257_v54 = vmul.f32 (!%p1669_p12), %v1163_v51, %v1132_v50  ;;  %v1209_v56 = vmul.f32 (!%p1669_p12), %v1164_v52, %v1132_v50 }
 0x1f7   : > { %1097 = vst [vmem:[%s2205_s19 + $0x30] sm:$0xff] %v1065_v55  ;;  %v1128_v55 = vld [vmem:[%s2180_s20 + $0x8] sm:$0xff] (!%p1669_p12) }
 0x1f8   : > { %1098 = vst [vmem:[%s2205_s19 + $0x38] sm:$0xff] %v1066_v57  ;;  %v1241_v57 = vmul.f32 (!%p1669_p12), %v1164_v52, %v1131_v49 }
 0x1fb   : > { %v1030_v60 = vpop.f32.mrb[6].mxu1 }
 0x1fc   : > { %v1081_v42 = vadd.f32 %v1030_v60, %v888_v58  ;;  %v1032_v61 = vpop.f32.mrb[7].mxu1  ;;  %v1159_v58 = vld [vmem:[%s2205_s19] sm:$0xff] (!%p1669_p12)  ;;  %v1133_v60 = vld [vmem:[%s2180_s20 + $0x30] sm:$0xff] (!%p1669_p12) }
 0x1fd   : > { %v1082_v62 = vadd.f32 %v1032_v61, %v889_v59  ;;  %v1160_v59 = vld [vmem:[%s2205_s19 + $0x8] sm:$0xff] (!%p1669_p12) }
 0x1fe   : > { %1113 = vst [vmem:[%s2205_s19 + $0xb0] sm:$0xff] %v1081_v42  ;;  %v1191_v42 = vmul.f32 (!%p1669_p12), %v1159_v58, %v1127_v2  ;;  %v1207_v61 = vmul.f32 (!%p1669_p12), %v1160_v59, %v1128_v55 }
 0x1ff   : > { %1114 = vst [vmem:[%s2205_s19 + $0xb8] sm:$0xff] %v1082_v62  ;;  %v1239_v62 = vmul.f32 (!%p1669_p12), %v1160_v59, %v1127_v2 }
 0x207   : > { %v988_v4 = vpop.f32.mrb[8].mxu0 }
 0x208   : > { %v1067_v1 = vadd.f32 %v988_v4, %v874_v63  ;;  %v990_v5 = vpop.f32.mrb[9].mxu0  ;;  %v1255_v63 = vmul.f32 (!%p1669_p12), %v1159_v58, %v1128_v55  ;;  %v1165_v4 = vld [vmem:[%s2205_s19 + $0x30] sm:$0xff] (!%p1669_p12) }
 0x209   : > { %v1068_v6 = vadd.f32 %v990_v5, %v875_v0  ;;  %v1134_v0 = vld [vmem:[%s2180_s20 + $0x38] sm:$0xff] (!%p1669_p12)  ;;  %v2537_v5 = vadd.f32 (!%p1669_p12), %v1209_v56, %v1193_v53  ;;  %v1139_v56 = vld [vmem:[%s2180_s20 + $0x60] sm:$0xff] (!%p1669_p12) }
 0x20a   : > { %1099 = vst [vmem:[%s2205_s19 + $0x40] sm:$0xff] %v1067_v1  ;;  %v1166_v1 = vld [vmem:[%s2205_s19 + $0x38] sm:$0xff] (!%p1669_p12) }
 0x20b   : > { %1100 = vst [vmem:[%s2205_s19 + $0x48] sm:$0xff] %v1068_v6  ;;  %v2539_v6 = vsub.f32 (!%p1669_p12), %v1241_v57, %v1257_v54 }
 0x20e   : > { %v1036_v9 = vpop.f32.mrb[8].mxu1 }
 0x20f   : > { %v1083_v10 = vadd.f32 %v1036_v9, %v890_v7  ;;  %v1038_v36 = vpop.f32.mrb[9].mxu1  ;;  %v1194_v7 = vmul.f32 (!%p1669_p12), %v1165_v4, %v1133_v60  ;;  %v1129_v9 = vld [vmem:[%s2180_s20 + $0x10] sm:$0xff] (!%p1669_p12) }
 0x210   : > { %v1084_v11 = vadd.f32 %v1038_v36, %v891_v8  ;;  %v1210_v8 = vmul.f32 (!%p1669_p12), %v1166_v1, %v1134_v0  ;;  %v1161_v36 = vld [vmem:[%s2205_s19 + $0x10] sm:$0xff] (!%p1669_p12) }
 0x211   : > { %1115 = vst [vmem:[%s2205_s19 + $0xc0] sm:$0xff] %v1083_v10  ;;  %v1130_v10 = vld [vmem:[%s2180_s20 + $0x18] sm:$0xff] (!%p1669_p12) }
 0x212   : > { %1116 = vst [vmem:[%s2205_s19 + $0xc8] sm:$0xff] %v1084_v11  ;;  %v2544_v11 = vadd.f32 (!%p1669_p12), %v1207_v61, %v1191_v42  ;;  %v1140_v42 = vld [vmem:[%s2180_s20 + $0x68] sm:$0xff] (!%p1669_p12) }
 0x21a   : > { %v994_v34 = vpop.f32.mrb[10].mxu0 }
 0x21b   : > { %v1069_v14 = vadd.f32 %v994_v34, %v876_v12  ;;  %v996_v15 = vpop.f32.mrb[11].mxu0  ;;  %v2546_v12 = vsub.f32 (!%p1669_p12), %v1239_v62, %v1255_v63  ;;  %v1258_v34 = vmul.f32 (!%p1669_p12), %v1165_v4, %v1134_v0 }
 0x21c   : > { %v1070_v16 = vadd.f32 %v996_v15, %v877_v13  ;;  %v1242_v13 = vmul.f32 (!%p1669_p12), %v1166_v1, %v1133_v60  ;;  %v1289_v15 = vmul.f32 (!%p1669_p12), %v2537_v5, %v2537_v5 }
 0x21d   : > { %1101 = vst [vmem:[%s2205_s19 + $0x50] sm:$0xff] %v1069_v14  ;;  %v1162_v14 = vld [vmem:[%s2205_s19 + $0x18] sm:$0xff] (!%p1669_p12) }
 0x21e   : > { %1102 = vst [vmem:[%s2205_s19 + $0x58] sm:$0xff] %v1070_v16  ;;  %v1305_v16 = vmul.f32 (!%p1669_p12), %v2539_v6, %v2539_v6 }
 0x221   : > { %v1042_v18 = vpop.f32.mrb[10].mxu1 }
 0x222   : > { %v1085_v19 = vadd.f32 %v1042_v18, %v892_v48  ;;  %v1044_v22 = vpop.f32.mrb[11].mxu1  ;;  %v2553_v48 = vadd.f32 (!%p1669_p12), %v1210_v8, %v1194_v7  ;;  %v1137_v18 = vld [vmem:[%s2180_s20 + $0x50] sm:$0xff] (!%p1669_p12) }
 0x223   : > { %v1086_v21 = vadd.f32 %v1044_v22, %v893_v17  ;;  %v1192_v17 = vmul.f32 (!%p1669_p12), %v1161_v36, %v1129_v9  ;;  %v1287_v22 = vmul.f32 (!%p1669_p12), %v2544_v11, %v2544_v11  ;;  %v1145_v7 = vld [vmem:[%s2180_s20 + $0x90] sm:$0xff] (!%p1669_p12) }
 0x224   : > { %1117 = vst [vmem:[%s2205_s19 + $0xd0] sm:$0xff] %v1085_v19  ;;  %v1169_v19 = vld [vmem:[%s2205_s19 + $0x50] sm:$0xff] (!%p1669_p12) }
 0x225   : > { %1118 = vst [vmem:[%s2205_s19 + $0xd8] sm:$0xff] %v1086_v21  ;;  %v1303_v21 = vmul.f32 (!%p1669_p12), %v2546_v12, %v2546_v12 }
 0x22d   : > { %v1000_v32 = vpop.f32.mrb[12].mxu0 }
 0x22e   : > { %v1071_v24 = vadd.f32 %v1000_v32, %v878_v3  ;;  %v1002_v25 = vpop.f32.mrb[13].mxu0  ;;  %v2561_v3 = vsub.f32 (!%p1669_p12), %v1242_v13, %v1258_v34  ;;  %v1138_v32 = vld [vmem:[%s2180_s20 + $0x58] sm:$0xff] (!%p1669_p12)  ;;  %v1177_v34 = vld [vmem:[%s2205_s19 + $0x90] sm:$0xff] (!%p1669_p12) }
 0x22f   : > { %v1072_v26 = vadd.f32 %v1002_v25, %v879_v23  ;;  %v1208_v23 = vmul.f32 (!%p1669_p12), %v1162_v14, %v1130_v10  ;;  %v1135_v25 = vld [vmem:[%s2180_s20 + $0x40] sm:$0xff] (!%p1669_p12)  ;;  %v1146_v13 = vld [vmem:[%s2180_s20 + $0x98] sm:$0xff] (!%p1669_p12) }
 0x230   : > { %1103 = vst [vmem:[%s2205_s19 + $0x60] sm:$0xff] %v1071_v24  ;;  %v1170_v24 = vld [vmem:[%s2205_s19 + $0x58] sm:$0xff] (!%p1669_p12) }
 0x231   : > { %1104 = vst [vmem:[%s2205_s19 + $0x68] sm:$0xff] %v1072_v26  ;;  %v1321_v26 = vadd.f32 (!%p1669_p12), %v1305_v16, %v1289_v15 }
 0x233   : > { %1339 = vadd.xlane.f32.xlu1 (!%p1669_p12), %v1321_v26  ;;  %v1176_v26 = vld [vmem:[%s2205_s19 + $0x88] sm:$0xff] (!%p1669_p12) }
 0x234   : > { %v1048_v29 = vpop.f32.mrb[12].mxu1 }
 0x235   : > { %v1087_v30 = vadd.f32 %v1048_v29, %v894_v27  ;;  %v1050_v31 = vpop.f32.mrb[13].mxu1  ;;  %v1290_v27 = vmul.f32 (!%p1669_p12), %v2553_v48, %v2553_v48  ;;  %v1256_v29 = vmul.f32 (!%p1669_p12), %v1161_v36, %v1130_v10 }
 0x236   : > { %v1088_v33 = vadd.f32 %v1050_v31, %v895_v28  ;;  %v1240_v28 = vmul.f32 (!%p1669_p12), %v1162_v14, %v1129_v9  ;;  %v1167_v31 = vld [vmem:[%s2205_s19 + $0x40] sm:$0xff] (!%p1669_p12)  ;;  %v1178_v14 = vld [vmem:[%s2205_s19 + $0x98] sm:$0xff] (!%p1669_p12) }
 0x237   : > { %1119 = vst [vmem:[%s2205_s19 + $0xe0] sm:$0xff] %v1087_v30  ;;  %v1136_v30 = vld [vmem:[%s2180_s20 + $0x48] sm:$0xff] (!%p1669_p12)  ;;  %v1195_v51 = vmul.f32 (!%p1669_p12), %v1167_v31, %v1135_v25  ;;  %v1171_v61 = vld [vmem:[%s2205_s19 + $0x60] sm:$0xff] (!%p1669_p12) }
 0x238   : > { %1120 = vst [vmem:[%s2205_s19 + $0xe8] sm:$0xff] %v1088_v33  ;;  %v1168_v33 = vld [vmem:[%s2205_s19 + $0x48] sm:$0xff] (!%p1669_p12)  ;;  %v1259_v58 = vmul.f32 (!%p1669_p12), %v1167_v31, %v1136_v30  ;;  %v1197_v16 = vmul.f32 (!%p1669_p12), %v1171_v61, %v1139_v56 }
 0x239   : > { %v1211_v52 = vmul.f32 (!%p1669_p12), %v1168_v33, %v1136_v30  ;;  %v1243_v55 = vmul.f32 (!%p1669_p12), %v1168_v33, %v1135_v25  ;;  %v1172_v62 = vld [vmem:[%s2205_s19 + $0x68] sm:$0xff] (!%p1669_p12)  ;;  %v1175_v25 = vld [vmem:[%s2205_s19 + $0x80] sm:$0xff] (!%p1669_p12)  ;;  %v1248_v30 = vmul.f32 (!%p1669_p12), %v1178_v14, %v1145_v7 }
 0x23b   : > { %v2590_v57 = vadd.f32 (!%p1669_p12), %v1211_v52, %v1195_v51  ;;  %v2600_v8 = vsub.f32 (!%p1669_p12), %v1243_v55, %v1259_v58  ;;  %v1179_v55 = vld [vmem:[%s2205_s19 + $0xa0] sm:$0xff] (!%p1669_p12) }
 0x23d   : > { %v1291_v9 = vmul.f32 (!%p1669_p12), %v2590_v57, %v2590_v57 }
 0x240   : > { %v1006_v38 = vpop.f32.mrb[14].mxu0 }
 0x241   : > { %v1073_v20 = vadd.f32 %v1006_v38, %v880_v35  ;;  %v1008_v39 = vpop.f32.mrb[15].mxu0  ;;  %v1319_v35 = vadd.f32 (!%p1669_p12), %v1303_v21, %v1287_v22  ;;  %v2573_v38 = vadd.f32 (!%p1669_p12), %v1208_v23, %v1192_v17  ;;  %v1213_v17 = vmul.f32 (!%p1669_p12), %v1172_v62, %v1140_v42 }
 0x242   : > { %v1074_v40 = vadd.f32 %v1008_v39, %v881_v37  ;;  %v1306_v37 = vmul.f32 (!%p1669_p12), %v2561_v3, %v2561_v3  ;;  %v1141_v39 = vld [vmem:[%s2180_s20 + $0x70] sm:$0xff] (!%p1669_p12)  ;;  %v1307_v22 = vmul.f32 (!%p1669_p12), %v2600_v8, %v2600_v8 }
 0x243   : > { %1105 = vst [vmem:[%s2205_s19 + $0x70] sm:$0xff] %v1073_v20  ;;  %v1196_v20 = vmul.f32 (!%p1669_p12), %v1169_v19, %v1137_v18  ;;  %1335 = vadd.xlane.f32.xlu0 (!%p1669_p12), %v1319_v35  ;;  %v1288_v50 = vmul.f32 (!%p1669_p12), %v2573_v38, %v2573_v38 }
 0x244   : > { %1106 = vst [vmem:[%s2205_s19 + $0x78] sm:$0xff] %v1074_v40  ;;  %v2576_v40 = vsub.f32 (!%p1669_p12), %v1240_v28, %v1256_v29  ;;  %v1322_v49 = vadd.f32 (!%p1669_p12), %v1306_v37, %v1290_v27  ;;  %v2619_v27 = vadd.f32 (!%p1669_p12), %v1213_v17, %v1197_v16  ;;  %v1200_v28 = vmul.f32 (!%p1669_p12), %v1177_v34, %v1145_v7  ;;  %v1185_v7 = vld [vmem:[%s2205_s19 + $0xd0] sm:$0xff] (!%p1669_p12) }
 0x245   : > { %1126 = sbr.rel (%p1669_p12) target bundleno = 772 (0x304), region = 56  ;;  %v1216_v29 = vmul.f32 (!%p1669_p12), %v1178_v14, %v1146_v13  ;;  %v1323_v31 = vadd.f32 (!%p1669_p12), %v1307_v22, %v1291_v9  ;;  %v1264_v37 = vmul.f32 (!%p1669_p12), %v1177_v34, %v1146_v13  ;;  %v1154_v14 = vld [vmem:[%s2180_s20 + $0xd8] sm:$0xff] (!%p1669_p12)  ;;  %v1151_v22 = vld [vmem:[%s2180_s20 + $0xc0] sm:$0xff] (!%p1669_p12) }
 0x246   : > { %v1304_v53 = vmul.f32 (!%p1669_p12), %v2576_v40, %v2576_v40  ;;  %1341 = vadd.xlane.f32.xlu1 (!%p1669_p12), %v1322_v49 }
 0x247   : > { %v1054_v44 = vpop.f32.mrb[14].mxu1  ;;  %v2635_v51 = vsub.f32 (!%p1669_p12), %v1248_v30, %v1264_v37 }
 0x248   : > { %v1089_v45 = vadd.f32 %v1054_v44, %v896_v41  ;;  %v1056_v46 = vpop.f32.mrb[15].mxu1  ;;  %v1212_v41 = vmul.f32 (!%p1669_p12), %v1170_v24, %v1138_v32  ;;  %v1260_v44 = vmul.f32 (!%p1669_p12), %v1169_v19, %v1138_v32  ;;  %v1320_v63 = vadd.f32 (!%p1669_p12), %v1304_v53, %v1288_v50  ;;  %v1143_v19 = vld [vmem:[%s2180_s20 + $0x80] sm:$0xff] (!%p1669_p12) }
 0x249   : > { %v1090_v47 = vadd.f32 %v1056_v46, %v897_v43  ;;  %v1244_v43 = vmul.f32 (!%p1669_p12), %v1170_v24, %v1137_v18  ;;  %v1245_v18 = vmul.f32 (!%p1669_p12), %v1172_v62, %v1139_v56  ;;  %v1261_v32 = vmul.f32 (!%p1669_p12), %v1171_v61, %v1140_v42  ;;  %v1144_v24 = vld [vmem:[%s2180_s20 + $0x88] sm:$0xff] (!%p1669_p12)  ;;  %v1147_v53 = vld [vmem:[%s2180_s20 + $0xa0] sm:$0xff] (!%p1669_p12) }
 0x24a   : > { %1121 = vst [vmem:[%s2205_s19 + $0xf0] sm:$0xff] %v1089_v45  ;;  %v1142_v45 = vld [vmem:[%s2180_s20 + $0x78] sm:$0xff] (!%p1669_p12)  ;;  %v1173_v46 = vld [vmem:[%s2205_s19 + $0x70] sm:$0xff] (!%p1669_p12)  ;;  %v2585_v54 = vadd.f32 (!%p1669_p12), %v1212_v41, %v1196_v20  ;;  %1337 = vadd.xlane.f32.xlu0 (!%p1669_p12), %v1320_v63  ;;  %v1293_v41 = vmul.f32 (!%p1669_p12), %v2619_v27, %v2619_v27  ;;  %v1247_v52 = vmul.f32 (!%p1669_p12), %v1176_v26, %v1143_v19  ;;  %v1148_v42 = vld [vmem:[%s2180_s20 + $0xa8] sm:$0xff] (!%p1669_p12) }
 0x24b   : > { %1122 = vst [vmem:[%s2205_s19 + $0xf8] sm:$0xff] %v1090_v47  ;;  %v1174_v47 = vld [vmem:[%s2205_s19 + $0x78] sm:$0xff] (!%p1669_p12)  ;;  %v2587_v2 = vsub.f32 (!%p1669_p12), %v1244_v43, %v1260_v44  ;;  %v1198_v59 = vmul.f32 (!%p1669_p12), %v1173_v46, %v1141_v39  ;;  %v1262_v36 = vmul.f32 (!%p1669_p12), %v1173_v46, %v1142_v45  ;;  %v2623_v35 = vsub.f32 (!%p1669_p12), %v1245_v18, %v1261_v32  ;;  %v1149_v20 = vld [vmem:[%s2180_s20 + $0xb0] sm:$0xff] (!%p1669_p12)  ;;  %v1180_v61 = vld [vmem:[%s2205_s19 + $0xa8] sm:$0xff] (!%p1669_p12) }
 0x24c   : > { %v1214_v60 = vmul.f32 %v1174_v47, %v1142_v45  ;;  %v1292_v0 = vmul.f32 %v2585_v54, %v2585_v54  ;;  %v1246_v1 = vmul.f32 %v1174_v47, %v1141_v39  ;;  %v1181_v39 = vld [vmem:[%s2205_s19 + $0xb0] sm:$0xff]  ;;  %v2629_v43 = vadd.f32 %v1216_v29, %v1200_v28  ;;  %v1150_v46 = vld [vmem:[%s2180_s20 + $0xb8] sm:$0xff]  ;;  %v1183_v28 = vld [vmem:[%s2205_s19 + $0xc0] sm:$0xff] }
 0x24d   : > { %v1308_v4 = vmul.f32 %v2587_v2, %v2587_v2  ;;  %v1199_v44 = vmul.f32 %v1175_v25, %v1143_v19  ;;  %v1215_v45 = vmul.f32 %v1176_v26, %v1144_v24  ;;  %v1182_v47 = vld [vmem:[%s2205_s19 + $0xb8] sm:$0xff]  ;;  %v1309_v50 = vmul.f32 %v2623_v35, %v2623_v35  ;;  %v1152_v26 = vld [vmem:[%s2180_s20 + $0xc8] sm:$0xff] }
 0x24e   : > { %v2604_v10 = vadd.f32 %v1214_v60, %v1198_v59  ;;  %v2612_v21 = vsub.f32 %v1246_v1, %v1262_v36  ;;  %1343 = vadd.xlane.f32.xlu0 %v1323_v31  ;;  %v1296_v56 = vmul.f32 %v2629_v43, %v2629_v43  ;;  %v1263_v59 = vmul.f32 %v1175_v25, %v1144_v24  ;;  %v1153_v1 = vld [vmem:[%s2180_s20 + $0xd0] sm:$0xff]  ;;  %v1184_v29 = vld [vmem:[%s2205_s19 + $0xc8] sm:$0xff] }
 0x24f   : > { %v1324_v15 = vadd.f32 %v1308_v4, %v1292_v0  ;;  %v2641_v58 = vadd.f32 %v1215_v45, %v1199_v44  ;;  %v1202_v60 = vmul.f32 %v1181_v39, %v1149_v20  ;;  %v1325_v62 = vadd.f32 %v1309_v50, %v1293_v41  ;;  %v1157_v45 = vld [vmem:[%s2180_s20 + $0xf0] sm:$0xff] }
 0x250   : > { %v1294_v23 = vmul.f32 %v2604_v10, %v2604_v10  ;;  %v1310_v33 = vmul.f32 %v2612_v21, %v2612_v21  ;;  %v1312_v63 = vmul.f32 %v2635_v51, %v2635_v51  ;;  %v1218_v0 = vmul.f32 %v1182_v47, %v1150_v46 }
 0x251   : > { %1345 = vadd.xlane.f32.xlu1 %v1324_v15  ;;  %v1250_v4 = vmul.f32 %v1182_v47, %v1149_v20  ;;  %v2649_v9 = vsub.f32 %v1247_v52, %v1263_v59  ;;  %v1295_v36 = vmul.f32 %v2641_v58, %v2641_v58  ;;  %v1266_v13 = vmul.f32 %v1181_v39, %v1150_v46  ;;  %v1186_v15 = vld [vmem:[%s2205_s19 + $0xd8] sm:$0xff]  ;;  %v1189_v46 = vld [vmem:[%s2205_s19 + $0xf0] sm:$0xff] }
 0x252   : > { %v1326_v49 = vadd.f32 %v1310_v33, %v1294_v23  ;;  %v1201_v34 = vmul.f32 %v1179_v55, %v1147_v53  ;;  %1347 = vadd.xlane.f32.xlu0 %v1325_v62  ;;  %v1328_v16 = vadd.f32 %v1312_v63, %v1296_v56  ;;  %v2655_v17 = vadd.f32 %v1218_v0, %v1202_v60  ;;  %v1187_v62 = vld [vmem:[%s2205_s19 + $0xe0] sm:$0xff] }
 0x253   : > { %v1217_v18 = vmul.f32 %v1180_v61, %v1148_v42  ;;  %v1249_v19 = vmul.f32 %v1180_v61, %v1147_v53  ;;  %v1311_v23 = vmul.f32 %v2649_v9, %v2649_v9  ;;  %v2660_v32 = vsub.f32 %v1250_v4, %v1266_v13  ;;  %v1158_v53 = vld [vmem:[%s2180_s20 + $0xf8] sm:$0xff]  ;;  %v1155_v61 = vld [vmem:[%s2180_s20 + $0xe0] sm:$0xff] }
 0x254   : > { %v1265_v24 = vmul.f32 %v1179_v55, %v1148_v42  ;;  %v1204_v25 = vmul.f32 %v1185_v7, %v1153_v1  ;;  %v1298_v30 = vmul.f32 %v2655_v17, %v2655_v17  ;;  %v1220_v33 = vmul.f32 %v1186_v15, %v1154_v14  ;;  %v1190_v55 = vld [vmem:[%s2205_s19 + $0xf8] sm:$0xff] }
 0x255   : > { %1349 = vadd.xlane.f32.xlu1 %v1326_v49  ;;  %v2667_v31 = vadd.f32 %v1217_v18, %v1201_v34  ;;  %v1252_v37 = vmul.f32 %v1186_v15, %v1153_v1  ;;  %v1327_v20 = vadd.f32 %v1311_v23, %v1295_v36  ;;  %v1314_v39 = vmul.f32 %v2660_v32, %v2660_v32  ;;  %v1188_v36 = vld [vmem:[%s2205_s19 + $0xe8] sm:$0xff] }
 0x256   : > { %v2671_v41 = vsub.f32 %v1249_v19, %v1265_v24  ;;  %v1268_v44 = vmul.f32 %v1185_v7, %v1154_v14  ;;  %v2677_v49 = vadd.f32 %v1220_v33, %v1204_v25  ;;  %v1203_v50 = vmul.f32 %v1183_v28, %v1151_v22  ;;  %v1156_v7 = vld [vmem:[%s2180_s20 + $0xe8] sm:$0xff] }
 0x257   : > { %v1297_v47 = vmul.f32 %v2667_v31, %v2667_v31  ;;  %v1219_v52 = vmul.f32 %v1184_v29, %v1152_v26  ;;  %1351 = vadd.xlane.f32.xlu0 %v1327_v20  ;;  %v1330_v56 = vadd.f32 %v1314_v39, %v1298_v30  ;;  %v1251_v42 = vmul.f32 %v1184_v29, %v1151_v22 }
 0x258   : > { %v1313_v59 = vmul.f32 %v2671_v41, %v2671_v41  ;;  %v2683_v60 = vsub.f32 %v1252_v37, %v1268_v44  ;;  %v1300_v63 = vmul.f32 %v2677_v49, %v2677_v49  ;;  %v1267_v4 = vmul.f32 %v1183_v28, %v1152_v26 }
 0x259   : > { %1353 = vadd.xlane.f32.xlu1 %v1328_v16  ;;  %v2689_v0 = vadd.f32 %v1219_v52, %v1203_v50  ;;  %v1206_v1 = vmul.f32 %v1189_v46, %v1157_v45  ;;  %v1222_v14 = vmul.f32 %v1190_v55, %v1158_v53  ;;  %v1254_v15 = vmul.f32 %v1190_v55, %v1157_v45 }
 0x25a   : > { %v1329_v13 = vadd.f32 %v1313_v59, %v1297_v47  ;;  %v1316_v34 = vmul.f32 %v2683_v60, %v2683_v60  ;;  %v2695_v16 = vsub.f32 %v1251_v42, %v1267_v4  ;;  %v1270_v19 = vmul.f32 %v1189_v46, %v1158_v53 }
 0x25b   : > { %v1299_v18 = vmul.f32 %v2689_v0, %v2689_v0  ;;  %v1205_v22 = vmul.f32 %v1187_v62, %v1155_v61  ;;  %v2699_v24 = vadd.f32 %v1222_v14, %v1206_v1  ;;  %v1221_v25 = vmul.f32 %v1188_v36, %v1156_v7 }
 0x25c   : > { %1355 = vadd.xlane.f32.xlu0 %v1329_v13  ;;  %v1332_v23 = vadd.f32 %v1316_v34, %v1300_v63  ;;  %v1253_v26 = vmul.f32 %v1188_v36, %v1155_v61  ;;  %v1315_v28 = vmul.f32 %v2695_v16, %v2695_v16  ;;  %v2703_v29 = vsub.f32 %v1254_v15, %v1270_v19 }
 0x25d   : > { %1357 = vadd.xlane.f32.xlu1 %v1330_v56  ;;  %v1269_v30 = vmul.f32 %v1187_v62, %v1156_v7  ;;  %v1302_v33 = vmul.f32 %v2699_v24, %v2699_v24  ;;  %v2707_v37 = vadd.f32 %v1221_v25, %v1205_v22 }
 0x25e   : > { %v1331_v20 = vadd.f32 %v1315_v28, %v1299_v18  ;;  %v1318_v39 = vmul.f32 %v2703_v29, %v2703_v29 }
 0x25f   : > { %v2711_v44 = vsub.f32 %v1253_v26, %v1269_v30  ;;  %v1301_v45 = vmul.f32 %v2707_v37, %v2707_v37 }
 0x260   : > { %1359 = vadd.xlane.f32.xlu0 %v1331_v20  ;;  %v1334_v46 = vadd.f32 %v1318_v39, %v1302_v33 }
 0x261   : > { %1361 = vadd.xlane.f32.xlu1 %v1332_v23  ;;  %v1317_v47 = vmul.f32 %v2711_v44, %v2711_v44 }
 0x263   : > { %v1333_v50 = vadd.f32 %v1317_v47, %v1301_v45 }
 0x265   : > { %1365 = vadd.xlane.f32.xlu1 %v1334_v46  ;;  %1363 = vadd.xlane.f32.xlu0 %v1333_v50 }
 0x2c0   : > { %v1340_v52 = vpop.xlane.xlu1 %1339 }
 0x2c1   : > { %1842 = vrsqrt.f32 %v1340_v52 }
 0x2cb   : > { %v1843_v42 = vpop.eup %1842 }
 0x2cc   : > { %v1385_v63 = vmul.f32 11.313708, %v1843_v42 }
 0x2ce   : > { %v1403_v7 = vmul.f32 %v1385_v63, %v2537_v5  ;;  %v1404_v36 = vmul.f32 %v1385_v63, %v2539_v6 }
 0x2d0   : > { %v1336_v53 = vpop.xlane.xlu0 %1335  ;;  %1435 = vst [vmem:[%s2205_s19 + $0x20] sm:$0xff] %v1403_v7  ;;  %1436 = vst [vmem:[%s2205_s19 + $0x28] sm:$0xff] %v1404_v36 }
 0x2d1   : > { %1844 = vrsqrt.f32 %v1336_v53 }
 0x2d3   : > { %v1342_v55 = vpop.xlane.xlu1 %1341 }
 0x2d4   : > { %1846 = vrsqrt.f32 %v1342_v55 }
 0x2d7   : > { %v1338_v56 = vpop.xlane.xlu0 %1337 }
 0x2d8   : > { %1848 = vrsqrt.f32 %v1338_v56 }
 0x2db   : > { %v1344_v61 = vpop.xlane.xlu0 %1343  ;;  %v1845_v62 = vpop.eup %1844 }
 0x2dc   : > { %v1383_v4 = vmul.f32 11.313708, %v1845_v62 }
 0x2de   : > { %v1346_v59 = vpop.xlane.xlu1 %1345  ;;  %v1847_v13 = vpop.eup %1846  ;;  %v1399_v34 = vmul.f32 %v1383_v4, %v2544_v11  ;;  %v1400_v14 = vmul.f32 %v1383_v4, %v2546_v12 }
 0x2df   : > { %1850 = vrsqrt.f32 %v1346_v59  ;;  %v1348_v15 = vpop.xlane.xlu0 %1347  ;;  %v1386_v18 = vmul.f32 11.313708, %v1847_v13 }
 0x2e0   : > { %1852 = vrsqrt.f32 %v1344_v61  ;;  %1431 = vst [vmem:[%s2205_s19] sm:$0xff] %v1399_v34  ;;  %1432 = vst [vmem:[%s2205_s19 + $0x8] sm:$0xff] %v1400_v14 }
 0x2e1   : > { %v1405_v6 = vmul.f32 %v1386_v18, %v2553_v48  ;;  %v1406_v22 = vmul.f32 %v1386_v18, %v2561_v3 }
 0x2e2   : > { %v1350_v1 = vpop.xlane.xlu1 %1349  ;;  %v1849_v19 = vpop.eup %1848 }
 0x2e3   : > { %1854 = vrsqrt.f32 %v1350_v1  ;;  %v1384_v11 = vmul.f32 11.313708, %v1849_v19  ;;  %1437 = vst [vmem:[%s2205_s19 + $0x30] sm:$0xff] %v1405_v6  ;;  %1438 = vst [vmem:[%s2205_s19 + $0x38] sm:$0xff] %v1406_v22 }
 0x2e4   : > { %1856 = vrsqrt.f32 %v1348_v15  ;;  %v1352_v28 = vpop.xlane.xlu0 %1351 }
 0x2e5   : > { %v1401_v12 = vmul.f32 %v1384_v11, %v2573_v38  ;;  %v1402_v25 = vmul.f32 %v1384_v11, %v2576_v40 }
 0x2e6   : > { %v1354_v5 = vpop.xlane.xlu1 %1353 }
 0x2e7   : > { %1858 = vrsqrt.f32 %v1354_v5  ;;  %1433 = vst [vmem:[%s2205_s19 + $0x10] sm:$0xff] %v1401_v12  ;;  %1434 = vst [vmem:[%s2205_s19 + $0x18] sm:$0xff] %v1402_v25 }
 0x2e8   : > { %1860 = vrsqrt.f32 %v1352_v28 }
 0x2e9   : > { %v1851_v23 = vpop.eup %1850  ;;  %v1356_v38 = vpop.xlane.xlu0 %1355 }
 0x2ea   : > { %v1388_v26 = vmul.f32 11.313708, %v1851_v23  ;;  %v1853_v30 = vpop.eup %1852  ;;  %v1358_v33 = vpop.xlane.xlu1 %1357 }
 0x2eb   : > { %v1387_v20 = vmul.f32 11.313708, %v1853_v30  ;;  %1862 = vrsqrt.f32 %v1358_v33 }
 0x2ec   : > { %v1409_v48 = vmul.f32 %v1388_v26, %v2585_v54  ;;  %v1410_v3 = vmul.f32 %v1388_v26, %v2587_v2  ;;  %1864 = vrsqrt.f32 %v1356_v38 }
 0x2ed   : > { %v1855_v39 = vpop.eup %1854  ;;  %v1407_v40 = vmul.f32 %v1387_v20, %v2590_v57  ;;  %v1408_v45 = vmul.f32 %v1387_v20, %v2600_v8  ;;  %v1360_v56 = vpop.xlane.xlu0 %1359 }
 0x2ee   : > { %1441 = vst [vmem:[%s2205_s19 + $0x50] sm:$0xff] %v1409_v48  ;;  %1442 = vst [vmem:[%s2205_s19 + $0x58] sm:$0xff] %v1410_v3  ;;  %v1390_v46 = vmul.f32 11.313708, %v1855_v39  ;;  %v1857_v47 = vpop.eup %1856  ;;  %v1362_v54 = vpop.xlane.xlu1 %1361 }
 0x2ef   : > { %1439 = vst [vmem:[%s2205_s19 + $0x40] sm:$0xff] %v1407_v40  ;;  %1440 = vst [vmem:[%s2205_s19 + $0x48] sm:$0xff] %v1408_v45  ;;  %v1389_v52 = vmul.f32 11.313708, %v1857_v47  ;;  %1866 = vrsqrt.f32 %v1362_v54 }
 0x2f0   : > { %v1413_v2 = vmul.f32 %v1390_v46, %v2604_v10  ;;  %v1414_v50 = vmul.f32 %v1390_v46, %v2612_v21  ;;  %1868 = vrsqrt.f32 %v1360_v56 }
 0x2f1   : > { %v1859_v53 = vpop.eup %1858  ;;  %v1411_v57 = vmul.f32 %v1389_v52, %v2619_v27  ;;  %v1412_v8 = vmul.f32 %v1389_v52, %v2623_v35 }
 0x2f2   : > { %1445 = vst [vmem:[%s2205_s19 + $0x70] sm:$0xff] %v1413_v2  ;;  %1446 = vst [vmem:[%s2205_s19 + $0x78] sm:$0xff] %v1414_v50  ;;  %v1392_v55 = vmul.f32 11.313708, %v1859_v53  ;;  %v1861_v59 = vpop.eup %1860  ;;  %v1366_v42 = vpop.xlane.xlu1 %1365 }
 0x2f3   : > { %1443 = vst [vmem:[%s2205_s19 + $0x60] sm:$0xff] %v1411_v57  ;;  %1444 = vst [vmem:[%s2205_s19 + $0x68] sm:$0xff] %v1412_v8  ;;  %v1391_v61 = vmul.f32 11.313708, %v1861_v59  ;;  %1870 = vrsqrt.f32 %v1366_v42  ;;  %v1364_v27 = vpop.xlane.xlu0 %1363 }
 0x2f4   : > { %v1417_v10 = vmul.f32 %v1392_v55, %v2629_v43  ;;  %v1418_v21 = vmul.f32 %v1392_v55, %v2635_v51  ;;  %1872 = vrsqrt.f32 %v1364_v27 }
 0x2f5   : > { %v1863_v62 = vpop.eup %1862  ;;  %v1415_v35 = vmul.f32 %v1391_v61, %v2641_v58  ;;  %v1416_v63 = vmul.f32 %v1391_v61, %v2649_v9 }
 0x2f6   : > { %1449 = vst [vmem:[%s2205_s19 + $0x90] sm:$0xff] %v1417_v10  ;;  %1450 = vst [vmem:[%s2205_s19 + $0x98] sm:$0xff] %v1418_v21  ;;  %v1394_v4 = vmul.f32 11.313708, %v1863_v62  ;;  %v1865_v43 = vpop.eup %1864 }
 0x2f7   : > { %1447 = vst [vmem:[%s2205_s19 + $0x80] sm:$0xff] %v1415_v35  ;;  %1448 = vst [vmem:[%s2205_s19 + $0x88] sm:$0xff] %v1416_v63  ;;  %v1393_v7 = vmul.f32 11.313708, %v1865_v43 }
 0x2f8   : > { %v1421_v51 = vmul.f32 %v1394_v4, %v2655_v17  ;;  %v1422_v1 = vmul.f32 %v1394_v4, %v2660_v32 }
 0x2f9   : > { %v1867_v36 = vpop.eup %1866  ;;  %v1419_v58 = vmul.f32 %v1393_v7, %v2667_v31  ;;  %v1420_v9 = vmul.f32 %v1393_v7, %v2671_v41 }
 0x2fa   : > { %1453 = vst [vmem:[%s2205_s19 + $0xb0] sm:$0xff] %v1421_v51  ;;  %1454 = vst [vmem:[%s2205_s19 + $0xb8] sm:$0xff] %v1422_v1  ;;  %v1396_v13 = vmul.f32 11.313708, %v1867_v36  ;;  %v1869_v34 = vpop.eup %1868 }
 0x2fb   : > { %1451 = vst [vmem:[%s2205_s19 + $0xa0] sm:$0xff] %v1419_v58  ;;  %1452 = vst [vmem:[%s2205_s19 + $0xa8] sm:$0xff] %v1420_v9  ;;  %v1395_v14 = vmul.f32 11.313708, %v1869_v34 }
 0x2fc   : > { %v1425_v17 = vmul.f32 %v1396_v13, %v2677_v49  ;;  %v1426_v32 = vmul.f32 %v1396_v13, %v2683_v60 }
 0x2fd   : > { %v1871_v15 = vpop.eup %1870  ;;  %v1423_v31 = vmul.f32 %v1395_v14, %v2689_v0  ;;  %v1424_v41 = vmul.f32 %v1395_v14, %v2695_v16 }
 0x2fe   : > { %1457 = vst [vmem:[%s2205_s19 + $0xd0] sm:$0xff] %v1425_v17  ;;  %1458 = vst [vmem:[%s2205_s19 + $0xd8] sm:$0xff] %v1426_v32  ;;  %v1398_v18 = vmul.f32 11.313708, %v1871_v15  ;;  %v1873_v19 = vpop.eup %1872 }
 0x2ff   : > { %1455 = vst [vmem:[%s2205_s19 + $0xc0] sm:$0xff] %v1423_v31  ;;  %1456 = vst [vmem:[%s2205_s19 + $0xc8] sm:$0xff] %v1424_v41  ;;  %v1397_v6 = vmul.f32 11.313708, %v1873_v19 }
 0x300   : > { %v1429_v5 = vmul.f32 %v1398_v18, %v2699_v24  ;;  %v1430_v49 = vmul.f32 %v1398_v18, %v2703_v29 }
 0x301   : > { %v1427_v60 = vmul.f32 %v1397_v6, %v2707_v37  ;;  %v1428_v22 = vmul.f32 %v1397_v6, %v2711_v44 }
 0x302   : > { %1461 = vst [vmem:[%s2205_s19 + $0xf0] sm:$0xff] %v1429_v5  ;;  %1462 = vst [vmem:[%s2205_s19 + $0xf8] sm:$0xff] %v1430_v49 }
 0x303   : > { %1459 = vst [vmem:[%s2205_s19 + $0xe0] sm:$0xff] %v1427_v60  ;;  %1460 = vst [vmem:[%s2205_s19 + $0xe8] sm:$0xff] %v1428_v22 }
 0x304 PF: > { %s1680_s5 = sshll.u32 %s1990_s23, 12  ;;  %s1478_s29 = sshll.u32 %s2205_s19, 4  ;;  %s2788_s29 = int_to_ptr.vmem [resolvable:$true] %s1478_s29 }
 0x305   : > { %s2785_s25 = scalar_lea.hbm %s2848_s6, %s1680_s5  ;;  %s1464_s30 = scalar_lea.sflag [#allocation4], %s2176_s17 }
 0x306   : > { %s1904_s18 = scalar_lea.vmem %s2788_s29, 4096  ;;  %p2865_p2 = scmp.ne.s32.totalorder %s2860_s10, 0 }
 0x307   : > { %p1905_p13 = scmp.ne.s32.totalorder %s2788_s29, %s1904_s18  ;;  %s2013_s20 = smov [#allocation5]  }
 0x308   : > { %s1908_s27 = sshll.u32 %s2013_s20, 4  ;;  %s1909_s27 = int_to_ptr.vmem [resolvable:$false] %s1908_s27 }
 0x309   : > { %p1906_p5 = pnand %p1905_p13, %p2865_p2  ;;  %s1910_s23 = scalar_lea.vmem %s1909_s27, 8192 }
 0x30a   : > { %p1911_p7 = scmp.lt.s32.totalorder %s2788_s29, %s1909_s27  ;;  %p1912_p8 = scmp.lt.s32.totalorder %s1910_s23, %s1904_s18 }
 0x30b   : > { %p1907_p3 = pneg %p1906_p5 }
 0x30c   : > { %p1913_p1 = por %p1912_p8, %p1911_p7 }
 0x30e   : > { %p1914_p4 = pnand %p1913_p1, %p1907_p3 }
 0x310   : > { %1917 = shalt.err (!%p1914_p4)
}
 0x311   : > { %s1918_s28 = scalar_lea.hbm %s2785_s25, 4096  ;;  %s1922_s16 = scalar_lea.hbm %s2848_s6, 16384 }
 0x312   : > { %p1919_p6 = scmp.ne.s32.totalorder %s2785_s25, %s1918_s28  ;;  %p1923_p0 = scmp.lt.u32.totalorder %s2785_s25, %s2848_s6 }
 0x313   : > { %p1924_p9 = scmp.lt.u32.totalorder %s1922_s16, %s1918_s28  ;;  %p1926_p13 = scmp.lt.u32.totalorder %s1918_s28, %s2785_s25 }
 0x314   : > { %p1920_p10 = pnand %p1919_p6, %p2865_p2 }
 0x315   : > { %p1925_p12 = por %p1924_p9, %p1923_p0 }
 0x316   : > { %p1921_p11 = pneg %p1920_p10 }
 0x317   : > { %p1927_p5 = por %p1926_p13, %p1925_p12 }
 0x319   : > { %p1928_p3 = pnand %p1927_p5, %p1921_p11 }
 0x31b   : > { %1931 = shalt.err (!%p1928_p3)
}
 0x31c   : > { %s2014_s9 = smov 256   ;;  %s2015_s13 = smov 16  }
 0x31d   : > { %1731 = dma.vmem_to_hbm [thread:$0]  (%p2865_p2), %s2788_s29, 4096, %s2785_s25, %s1464_s30, %s2014_s9, %s2014_s9, %s2015_s13  }
 0x31e PF: > { %p1742_p7 = scmp.ge.s32.totalorder %s2002_s26, 2  ;;  %s1493_s19 = sand.u32 1, %s1974_s21  }
 0x31f   : > { %p2866_p8 = scmp.ne.s32.totalorder %s2861_s12, 0  ;;  %s1494_s5 = scalar_lea.sflag [#allocation4], %s1493_s19 }
 0x321   : > { %p1738_p1 = pnand %p1742_p7, %p2866_p8 }
 0x323   : > { %1969 = dma.done.wait (!%p1738_p1), %s1494_s5, 4096  }
 0x324   : > { %1971 = vsyncadd (!%p1738_p1), %s1494_s5, 4294963200  ;;  %s22_s26 = sadd.s32 1, %s2002_s26   ;;  %s2867_s3 = sld [smem:[#allocation8_spill]] }
 0x325   : > { %p19_p4 = scmp.ge.s32.totalorder %s22_s26, 18   ;;  %s2868_s23 = sld [smem:[#allocation9_spill]] }
 0x326   : > { %s2869_s24 = sld [smem:[#allocation10_spill]]  ;;  %s2870_s25 = sld [smem:[#allocation11_spill]] }
 0x327   : > { %s2871_s21 = smov %s1978_s22  ;;  %s2872_s22 = smov %s1982_s2 }
 0x328   : > { %s2873_s2 = smov %s2127_s14  ;;  %21 = sbr.rel (!%p19_p4) target bundleno = 9 (0x9), region = 112 }
 0x32f   :  { %1499 = vsyncpa [#allocation3], 1 }
 0x330   :  { %1501 = vsyncpa [#allocation3 + $0x1], 1 }
 0x331   :  { %1502 = vsyncpa [#allocation4], 1 }
 0x332   :  { %1504 = vsyncpa [#allocation4 + $0x1], 1 }

</bundles_post_ra>
